<compile_context>
chip_gen: v7x
topology: tpu7x:2x2x1
jax: 0.10.0
libtpu: 0.0.40
codegen_flags: <defaults>
</compile_context>

<pallas_src>
import jax
import jax.numpy as jnp
import numpy as np
from jax.experimental import pallas as pl
from jax.experimental.pallas import tpu as pltpu

EPS = 1e-5


def _basic_block_kernel(x_ref, t1_ref, t2_ref, p_ref, pt_ref,
                        g1_ref, b1_ref, g2_ref, b2_ref,
                        out_ref, pad_ref):
    """Fused BasicBlock forward.

    x_ref   : (N, H, W*C)         f32   channels-last input, lane-dense rows
    t1_ref  : (3, (W+2)*C, W*C)   bf16  block-Toeplitz conv1 weights (per kh)
    t2_ref  : (3, (W+2)*C, W*C)   bf16  block-Toeplitz conv2 weights (per kh)
    p_ref   : (W*C, C)            f32   lane -> channel pooling matrix
    pt_ref  : (C, W*C)            f32   channel -> lane broadcast matrix
    g*/b*   : (1, C)              f32   BN affine (gamma / beta)
    out_ref : (N*H, W*C)          f32   lane-dense output rows
    pad_ref : (N, H+2, (W+2)*C)   bf16  VMEM scratch: H/W zero-padded rows
    """
    N, H, WC = x_ref.shape
    C = p_ref.shape[1]
    W = WC // C
    Hp = H + 2
    WpC = (W + 2) * C
    M = N * H
    cnt = float(N * H * W)

    # ---- halo-only zeroing of the padded scratch (shared by both convs) ----
    zrow = jnp.zeros((N, 1, WpC), jnp.bfloat16)
    pad_ref[:, 0:1, :] = zrow                   # top zero row
    pad_ref[:, H + 1:H + 2, :] = zrow           # bottom zero row
    pad_ref[:, :, WC:] = jnp.zeros((N, Hp, WpC - WC), jnp.bfloat16)  # W pad cols

    x = x_ref[...]                              # (N, H, W*C) f32 (also residual)
    pad_ref[:, 1:H + 1, 0:WC] = x.astype(jnp.bfloat16)

    p = p_ref[...]
    pt = pt_ref[...]

    def conv3x3(t_ref):
        # 3 matmuls: (M, (W+2)C) x ((W+2)C, W*C), f32 accumulation on the MXU.
        acc = jnp.zeros((M, WC), jnp.float32)
        for kh in range(3):
            lhs = pad_ref[:, kh:kh + H, :].reshape(M, WpC)        # bf16
            acc = acc + jnp.dot(lhs, t_ref[kh],
                                preferred_element_type=jnp.float32)
        return acc

    def bn_scale_shift(acc, g_ref, b_ref):
        # One-pass training-mode batch stats (biased variance), f32 throughout.
        colsum = jnp.sum(acc, axis=0, keepdims=True)              # (1, W*C)
        colsq = jnp.sum(acc * acc, axis=0, keepdims=True)         # (1, W*C)
        mean = jnp.dot(colsum, p, preferred_element_type=jnp.float32) / cnt
        ex2 = jnp.dot(colsq, p, preferred_element_type=jnp.float32) / cnt
        var = ex2 - mean * mean                                   # (1, C)
        scale = g_ref[...] * jax.lax.rsqrt(var + EPS)             # (1, C), EUP
        shift = b_ref[...] - mean * scale
        # Broadcast per-channel scale/shift back to the 128-lane layout.
        scale_l = jnp.dot(scale, pt, preferred_element_type=jnp.float32)
        shift_l = jnp.dot(shift, pt, preferred_element_type=jnp.float32)
        return scale_l, shift_l

    # ---- conv1 -> bn1 -> relu ----
    acc1 = conv3x3(t1_ref)
    s1, sh1 = bn_scale_shift(acc1, g1_ref, b1_ref)
    h1 = jnp.maximum(acc1 * s1 + sh1, 0.0)                        # (M, W*C) f32

    # ---- refill the (still zero-haloed) scratch interior with h1 ----
    pad_ref[:, 1:H + 1, 0:WC] = h1.reshape(N, H, WC).astype(jnp.bfloat16)

    # ---- conv2 -> bn2 -> + identity -> relu (lane-dense residual & output) ----
    acc2 = conv3x3(t2_ref)
    s2, sh2 = bn_scale_shift(acc2, g2_ref, b2_ref)
    identity = x.reshape(M, WC)                                   # f32, Cin == Cout
    out_ref[...] = jnp.maximum(acc2 * s2 + sh2 + identity, 0.0)


def _block_toeplitz(w_hwio, W):
    """(3,3,Ci,Co) HWIO conv weights -> (3, (W+2)*Ci, W*Co) block-Toeplitz mats.

    Padded-row lane layout:  lane = wi*Ci + ci, wi in [0, W+2) (wi >= W is zero pad).
    Output-row lane layout:  lane = wo*Co + co, wo in [0, W).
    T[kh, wi*Ci+ci, wo*Co+co] = w[kh, wi-wo+1, ci, co] if 0 <= wi-wo+1 < 3 and wi < W.
    """
    _, _, Ci, Co = w_hwio.shape
    wi = np.arange(W + 2)[:, None, None]
    wo = np.arange(W)[None, :, None]
    kw = np.arange(3)[None, None, :]
    sel = ((wi == wo + kw - 1) & (wi < W)).astype(np.float32)     # (W+2, W, 3)
    t = jnp.einsum('iok,hkcd->hicod', sel, w_hwio.astype(jnp.float32))
    return t.reshape(3, (W + 2) * Ci, W * Co)


def basic_block_forward(x_nchw, params):
    """Pallas forward. x_nchw: (N, C, H, W) float32 (PyTorch layout)."""
    w1, w2, g1, b1, g2, b2 = params
    N, Cin, H, W = x_nchw.shape
    Cout = w1.shape[-1]
    assert w1.shape[2] == Cin and w2.shape[2] == Cout and w2.shape[3] == Cout
    assert Cin == Cout, "stride=1 / downsample=None BasicBlock requires Cin == Cout"

    x = jnp.transpose(x_nchw, (0, 2, 3, 1)).astype(jnp.float32)   # NHWC
    x_rows = x.reshape(N, H, W * Cin)                             # lane-dense rows

    t1 = _block_toeplitz(w1, W).astype(jnp.bfloat16)              # (3,(W+2)Cin,W*Cout)
    t2 = _block_toeplitz(w2, W).astype(jnp.bfloat16)

    eye = jnp.eye(Cout, dtype=jnp.float32)
    p = jnp.tile(eye, (W, 1))       # (W*Cout, Cout): lane -> channel pooling
    pt = jnp.tile(eye, (1, W))      # (Cout, W*Cout): channel -> lane broadcast

    flops = 2 * (2 * 3 * (N * H) * ((W + 2) * Cin) * (W * Cout))
    bytes_accessed = (x_rows.size + N * H * W * Cout) * 4 + (t1.size + t2.size) * 2

    out_rows = pl.pallas_call(
        _basic_block_kernel,
        out_shape=jax.ShapeDtypeStruct((N * H, W * Cout), jnp.float32),
        in_specs=[pl.BlockSpec(memory_space=pltpu.MemorySpace.VMEM)] * 9,
        out_specs=pl.BlockSpec(memory_space=pltpu.MemorySpace.VMEM),
        scratch_shapes=[pltpu.VMEM((N, H + 2, (W + 2) * Cin), jnp.bfloat16)],
        cost_estimate=pl.CostEstimate(flops=flops, transcendentals=2 * Cout,
                                      bytes_accessed=bytes_accessed),
    )(x_rows, t1, t2, p, pt,
      g1.reshape(1, -1).astype(jnp.float32), b1.reshape(1, -1).astype(jnp.float32),
      g2.reshape(1, -1).astype(jnp.float32), b2.reshape(1, -1).astype(jnp.float32))

    out = out_rows.reshape(N, H, W, Cout)
    return jnp.transpose(out, (0, 3, 1, 2))                       # -> NCHW


def basic_block_reference(x_nchw, params):
    """Pure-JAX reference with identical semantics (for verification)."""
    w1, w2, g1, b1, g2, b2 = params
    x = jnp.transpose(x_nchw, (0, 2, 3, 1)).astype(jnp.float32)
    dn = ('NHWC', 'HWIO', 'NHWC')

    def conv(h, w):
        return jax.lax.conv_general_dilated(h, w, (1, 1), 'SAME',
                                            dimension_numbers=dn)

    def bn(h, g, b):
        mean = jnp.mean(h, axis=(0, 1, 2), keepdims=True)
        var = jnp.mean((h - mean) ** 2, axis=(0, 1, 2), keepdims=True)
        return (h - mean) * jax.lax.rsqrt(var + EPS) * g + b

    h = jax.nn.relu(bn(conv(x, w1), g1, b1))
    h = bn(conv(h, w2), g2, b2)
    out = jax.nn.relu(h + x)
    return jnp.transpose(out, (0, 3, 1, 2))


def init_params(key, cin, cout):
    """Deterministic parameter init (shapes from BasicBlock.__init__)."""
    k1, k2 = jax.random.split(key)
    # conv weights, HWIO layout; kaiming-like scale (fan_in = 9 * Cin)
    w1 = jax.random.normal(k1, (3, 3, cin, cout), jnp.float32) * np.sqrt(2.0 / (9 * cin))
    w2 = jax.random.normal(k2, (3, 3, cout, cout), jnp.float32) * np.sqrt(2.0 / (9 * cout))
    # BatchNorm2d default init: gamma = 1, beta = 0
    g1 = jnp.ones((cout,), jnp.float32)
    b1 = jnp.zeros((cout,), jnp.float32)
    g2 = jnp.ones((cout,), jnp.float32)
    b2 = jnp.zeros((cout,), jnp.float32)
    return (w1, w2, g1, b1, g2, b2)


if __name__ == "__main__":
    # Cin == Cout (stride=1, downsample=None); W * C = 128 -> lane-dense rows.
    N, C, H, W = 2, 8, 16, 16
    key = jax.random.PRNGKey(0)
    kx, kp = jax.random.split(key)
    x = jax.random.normal(kx, (N, C, H, W), jnp.float32)
    params = init_params(kp, C, C)

    out = jax.block_until_ready(basic_block_forward(x, params))
    ref = jax.block_until_ready(basic_block_reference(x, params))

    assert out.shape == (N, C, H, W)
    # bf16 MXU inputs (f32 accumulation) => slightly looser tolerance than pure f32.
    np.testing.assert_allclose(np.asarray(out), np.asarray(ref),
                               rtol=2e-2, atol=2e-2)
    print("KERNEL_OK")
</pallas_src>

<mosaic_0001>
module attributes {stable_mosaic.version = 11 : i64} {
  func.func @_basic_block_kernel(%arg0: memref<2x16x128xf32, #tpu.memory_space<vmem>>, %arg1: memref<3x144x128xbf16, #tpu.memory_space<vmem>>, %arg2: memref<3x144x128xbf16, #tpu.memory_space<vmem>>, %arg3: memref<128x8xf32, #tpu.memory_space<vmem>>, %arg4: memref<8x128xf32, #tpu.memory_space<vmem>>, %arg5: memref<1x8xf32, #tpu.memory_space<vmem>>, %arg6: memref<1x8xf32, #tpu.memory_space<vmem>>, %arg7: memref<1x8xf32, #tpu.memory_space<vmem>>, %arg8: memref<1x8xf32, #tpu.memory_space<vmem>>, %arg9: memref<32x128xf32, #tpu.memory_space<vmem>>, %arg10: memref<2x18x144xbf16, #tpu.memory_space<vmem>>) attributes {dimension_semantics = [], scalar_prefetch = 0 : i64, scratch_operands = 1 : i64, tpu.core_type = #tpu.core_type<tc>} {
    %cst = arith.constant 0.000000e+00 : bf16
    %0 = vector.broadcast %cst : bf16 to vector<2x1x144xbf16>
    %c0 = arith.constant 0 : index
    %c0_0 = arith.constant 0 : index
    %c0_1 = arith.constant 0 : index
    %1 = vector.load %arg10[%c0, %c0_0, %c0_1] : memref<2x18x144xbf16, #tpu.memory_space<vmem>>, vector<2x1x144xbf16>
    tpu.vector_store %arg10[%c0, %c0_0, %c0_1], %0 {strides = array<i32>} : memref<2x18x144xbf16, #tpu.memory_space<vmem>>, vector<2x1x144xbf16>,
    %c0_2 = arith.constant 0 : index
    %c17 = arith.constant 17 : index
    %c0_3 = arith.constant 0 : index
    %2 = vector.load %arg10[%c0_2, %c17, %c0_3] : memref<2x18x144xbf16, #tpu.memory_space<vmem>>, vector<2x1x144xbf16>
    tpu.vector_store %arg10[%c0_2, %c17, %c0_3], %0 {strides = array<i32>} : memref<2x18x144xbf16, #tpu.memory_space<vmem>>, vector<2x1x144xbf16>,
    %cst_4 = arith.constant 0.000000e+00 : bf16
    %3 = vector.broadcast %cst_4 : bf16 to vector<2x18x16xbf16>
    %c0_5 = arith.constant 0 : index
    %c0_6 = arith.constant 0 : index
    %c128 = arith.constant 128 : index
    %4 = vector.load %arg10[%c0_5, %c0_6, %c128] : memref<2x18x144xbf16, #tpu.memory_space<vmem>>, vector<2x18x16xbf16>
    tpu.vector_store %arg10[%c0_5, %c0_6, %c128], %3 {strides = array<i32>} : memref<2x18x144xbf16, #tpu.memory_space<vmem>>, vector<2x18x16xbf16>,
    %c0_7 = arith.constant 0 : index
    %c0_8 = arith.constant 0 : index
    %c0_9 = arith.constant 0 : index
    %5 = vector.load %arg0[%c0_7, %c0_8, %c0_9] : memref<2x16x128xf32, #tpu.memory_space<vmem>>, vector<2x16x128xf32>
    %6 = arith.truncf %5 : vector<2x16x128xf32> to vector<2x16x128xbf16>
    %c0_10 = arith.constant 0 : index
    %c1 = arith.constant 1 : index
    %c0_11 = arith.constant 0 : index
    %7 = vector.load %arg10[%c0_10, %c1, %c0_11] : memref<2x18x144xbf16, #tpu.memory_space<vmem>>, vector<2x16x128xbf16>
    tpu.vector_store %arg10[%c0_10, %c1, %c0_11], %6 {strides = array<i32>} : memref<2x18x144xbf16, #tpu.memory_space<vmem>>, vector<2x16x128xbf16>,
    %c0_12 = arith.constant 0 : index
    %c0_13 = arith.constant 0 : index
    %8 = vector.load %arg3[%c0_12, %c0_13] : memref<128x8xf32, #tpu.memory_space<vmem>>, vector<128x8xf32>
    %c0_14 = arith.constant 0 : index
    %c0_15 = arith.constant 0 : index
    %9 = vector.load %arg4[%c0_14, %c0_15] : memref<8x128xf32, #tpu.memory_space<vmem>>, vector<8x128xf32>
    %cst_16 = arith.constant 0.000000e+00 : f32
    %10 = vector.broadcast %cst_16 : f32 to vector<32x128xf32>
    %c0_17 = arith.constant 0 : index
    %c0_18 = arith.constant 0 : index
    %c0_19 = arith.constant 0 : index
    %11 = vector.load %arg10[%c0_17, %c0_18, %c0_19] : memref<2x18x144xbf16, #tpu.memory_space<vmem>>, vector<2x16x144xbf16>
    %12 = vector.shape_cast %11 : vector<2x16x144xbf16> to vector<32x144xbf16>
    %c0_20 = arith.constant 0 : index
    %c0_21 = arith.constant 0 : index
    %c0_22 = arith.constant 0 : index
    %13 = vector.load %arg1[%c0_20, %c0_21, %c0_22] : memref<3x144x128xbf16, #tpu.memory_space<vmem>>, vector<1x144x128xbf16>
    %14 = vector.shape_cast %13 : vector<1x144x128xbf16> to vector<144x128xbf16>
    %cst_23 = arith.constant dense<0.000000e+00> : vector<32x128xf32>
    %15 = tpu.matmul %12, %14, %cst_23 {dimension_numbers = #tpu.dot_dimension_numbers<[1], [0], [0], [1], [0, 0, 1, 1], [], []>} : vector<32x144xbf16>, vector<144x128xbf16>, vector<32x128xf32> -> vector<32x128xf32>
    %16 = arith.addf %10, %15 : vector<32x128xf32>
    %c0_24 = arith.constant 0 : index
    %c1_25 = arith.constant 1 : index
    %c0_26 = arith.constant 0 : index
    %17 = vector.load %arg10[%c0_24, %c1_25, %c0_26] : memref<2x18x144xbf16, #tpu.memory_space<vmem>>, vector<2x16x144xbf16>
    %18 = vector.shape_cast %17 : vector<2x16x144xbf16> to vector<32x144xbf16>
    %c1_27 = arith.constant 1 : index
    %c0_28 = arith.constant 0 : index
    %c0_29 = arith.constant 0 : index
    %19 = vector.load %arg1[%c1_27, %c0_28, %c0_29] : memref<3x144x128xbf16, #tpu.memory_space<vmem>>, vector<1x144x128xbf16>
    %20 = vector.shape_cast %19 : vector<1x144x128xbf16> to vector<144x128xbf16>
    %cst_30 = arith.constant dense<0.000000e+00> : vector<32x128xf32>
    %21 = tpu.matmul %18, %20, %cst_30 {dimension_numbers = #tpu.dot_dimension_numbers<[1], [0], [0], [1], [0, 0, 1, 1], [], []>} : vector<32x144xbf16>, vector<144x128xbf16>, vector<32x128xf32> -> vector<32x128xf32>
    %22 = arith.addf %16, %21 : vector<32x128xf32>
    %c0_31 = arith.constant 0 : index
    %c2 = arith.constant 2 : index
    %c0_32 = arith.constant 0 : index
    %23 = vector.load %arg10[%c0_31, %c2, %c0_32] : memref<2x18x144xbf16, #tpu.memory_space<vmem>>, vector<2x16x144xbf16>
    %24 = vector.shape_cast %23 : vector<2x16x144xbf16> to vector<32x144xbf16>
    %c2_33 = arith.constant 2 : index
    %c0_34 = arith.constant 0 : index
    %c0_35 = arith.constant 0 : index
    %25 = vector.load %arg1[%c2_33, %c0_34, %c0_35] : memref<3x144x128xbf16, #tpu.memory_space<vmem>>, vector<1x144x128xbf16>
    %26 = vector.shape_cast %25 : vector<1x144x128xbf16> to vector<144x128xbf16>
    %cst_36 = arith.constant dense<0.000000e+00> : vector<32x128xf32>
    %27 = tpu.matmul %24, %26, %cst_36 {dimension_numbers = #tpu.dot_dimension_numbers<[1], [0], [0], [1], [0, 0, 1, 1], [], []>} : vector<32x144xbf16>, vector<144x128xbf16>, vector<32x128xf32> -> vector<32x128xf32>
    %28 = arith.addf %22, %27 : vector<32x128xf32>
    %cst_37 = arith.constant dense<0.000000e+00> : vector<128xf32>
    %29 = vector.multi_reduction <add>, %28, %cst_37 [0] : vector<32x128xf32> to vector<128xf32>
    %30 = vector.shape_cast %29 : vector<128xf32> to vector<1x128xf32>
    %31 = arith.mulf %28, %28 : vector<32x128xf32>
    %cst_38 = arith.constant dense<0.000000e+00> : vector<128xf32>
    %32 = vector.multi_reduction <add>, %31, %cst_38 [0] : vector<32x128xf32> to vector<128xf32>
    %33 = vector.shape_cast %32 : vector<128xf32> to vector<1x128xf32>
    %cst_39 = arith.constant dense<0.000000e+00> : vector<1x8xf32>
    %34 = tpu.matmul %30, %8, %cst_39 {dimension_numbers = #tpu.dot_dimension_numbers<[1], [0], [0], [1], [0, 0, 1, 1], [], []>} : vector<1x128xf32>, vector<128x8xf32>, vector<1x8xf32> -> vector<1x8xf32>
    %cst_40 = arith.constant 5.120000e+02 : f32
    %35 = vector.broadcast %cst_40 : f32 to vector<1x8xf32>
    %36 = arith.divf %34, %35 : vector<1x8xf32>
    %cst_41 = arith.constant dense<0.000000e+00> : vector<1x8xf32>
    %37 = tpu.matmul %33, %8, %cst_41 {dimension_numbers = #tpu.dot_dimension_numbers<[1], [0], [0], [1], [0, 0, 1, 1], [], []>} : vector<1x128xf32>, vector<128x8xf32>, vector<1x8xf32> -> vector<1x8xf32>
    %cst_42 = arith.constant 5.120000e+02 : f32
    %38 = vector.broadcast %cst_42 : f32 to vector<1x8xf32>
    %39 = arith.divf %37, %38 : vector<1x8xf32>
    %40 = arith.mulf %36, %36 : vector<1x8xf32>
    %41 = arith.subf %39, %40 : vector<1x8xf32>
    %c0_43 = arith.constant 0 : index
    %c0_44 = arith.constant 0 : index
    %42 = vector.load %arg5[%c0_43, %c0_44] : memref<1x8xf32, #tpu.memory_space<vmem>>, vector<1x8xf32>
    %cst_45 = arith.constant 9.99999974E-6 : f32
    %43 = vector.broadcast %cst_45 : f32 to vector<1x8xf32>
    %44 = arith.addf %41, %43 : vector<1x8xf32>
    %45 = math.rsqrt %44 : vector<1x8xf32>
    %46 = arith.mulf %42, %45 : vector<1x8xf32>
    %c0_46 = arith.constant 0 : index
    %c0_47 = arith.constant 0 : index
    %47 = vector.load %arg6[%c0_46, %c0_47] : memref<1x8xf32, #tpu.memory_space<vmem>>, vector<1x8xf32>
    %48 = arith.mulf %36, %46 : vector<1x8xf32>
    %49 = arith.subf %47, %48 : vector<1x8xf32>
    %cst_48 = arith.constant dense<0.000000e+00> : vector<1x128xf32>
    %50 = tpu.matmul %46, %9, %cst_48 {dimension_numbers = #tpu.dot_dimension_numbers<[1], [0], [0], [1], [0, 0, 1, 1], [], []>} : vector<1x8xf32>, vector<8x128xf32>, vector<1x128xf32> -> vector<1x128xf32>
    %cst_49 = arith.constant dense<0.000000e+00> : vector<1x128xf32>
    %51 = tpu.matmul %49, %9, %cst_49 {dimension_numbers = #tpu.dot_dimension_numbers<[1], [0], [0], [1], [0, 0, 1, 1], [], []>} : vector<1x8xf32>, vector<8x128xf32>, vector<1x128xf32> -> vector<1x128xf32>
    %52 = vector.broadcast %50 : vector<1x128xf32> to vector<32x128xf32>
    %53 = arith.mulf %28, %52 : vector<32x128xf32>
    %54 = vector.broadcast %51 : vector<1x128xf32> to vector<32x128xf32>
    %55 = arith.addf %53, %54 : vector<32x128xf32>
    %cst_50 = arith.constant 0.000000e+00 : f32
    %56 = vector.broadcast %cst_50 : f32 to vector<32x128xf32>
    %57 = arith.maximumf %55, %56 : vector<32x128xf32>
    %58 = vector.shape_cast %57 : vector<32x128xf32> to vector<2x16x128xf32>
    %59 = arith.truncf %58 : vector<2x16x128xf32> to vector<2x16x128xbf16>
    %c0_51 = arith.constant 0 : index
    %c1_52 = arith.constant 1 : index
    %c0_53 = arith.constant 0 : index
    %60 = vector.load %arg10[%c0_51, %c1_52, %c0_53] : memref<2x18x144xbf16, #tpu.memory_space<vmem>>, vector<2x16x128xbf16>
    tpu.vector_store %arg10[%c0_51, %c1_52, %c0_53], %59 {strides = array<i32>} : memref<2x18x144xbf16, #tpu.memory_space<vmem>>, vector<2x16x128xbf16>,
    %cst_54 = arith.constant 0.000000e+00 : f32
    %61 = vector.broadcast %cst_54 : f32 to vector<32x128xf32>
    %c0_55 = arith.constant 0 : index
    %c0_56 = arith.constant 0 : index
    %c0_57 = arith.constant 0 : index
    %62 = vector.load %arg10[%c0_55, %c0_56, %c0_57] : memref<2x18x144xbf16, #tpu.memory_space<vmem>>, vector<2x16x144xbf16>
    %63 = vector.shape_cast %62 : vector<2x16x144xbf16> to vector<32x144xbf16>
    %c0_58 = arith.constant 0 : index
    %c0_59 = arith.constant 0 : index
    %c0_60 = arith.constant 0 : index
    %64 = vector.load %arg2[%c0_58, %c0_59, %c0_60] : memref<3x144x128xbf16, #tpu.memory_space<vmem>>, vector<1x144x128xbf16>
    %65 = vector.shape_cast %64 : vector<1x144x128xbf16> to vector<144x128xbf16>
    %cst_61 = arith.constant dense<0.000000e+00> : vector<32x128xf32>
    %66 = tpu.matmul %63, %65, %cst_61 {dimension_numbers = #tpu.dot_dimension_numbers<[1], [0], [0], [1], [0, 0, 1, 1], [], []>} : vector<32x144xbf16>, vector<144x128xbf16>, vector<32x128xf32> -> vector<32x128xf32>
    %67 = arith.addf %61, %66 : vector<32x128xf32>
    %c0_62 = arith.constant 0 : index
    %c1_63 = arith.constant 1 : index
    %c0_64 = arith.constant 0 : index
    %68 = vector.load %arg10[%c0_62, %c1_63, %c0_64] : memref<2x18x144xbf16, #tpu.memory_space<vmem>>, vector<2x16x144xbf16>
    %69 = vector.shape_cast %68 : vector<2x16x144xbf16> to vector<32x144xbf16>
    %c1_65 = arith.constant 1 : index
    %c0_66 = arith.constant 0 : index
    %c0_67 = arith.constant 0 : index
    %70 = vector.load %arg2[%c1_65, %c0_66, %c0_67] : memref<3x144x128xbf16, #tpu.memory_space<vmem>>, vector<1x144x128xbf16>
    %71 = vector.shape_cast %70 : vector<1x144x128xbf16> to vector<144x128xbf16>
    %cst_68 = arith.constant dense<0.000000e+00> : vector<32x128xf32>
    %72 = tpu.matmul %69, %71, %cst_68 {dimension_numbers = #tpu.dot_dimension_numbers<[1], [0], [0], [1], [0, 0, 1, 1], [], []>} : vector<32x144xbf16>, vector<144x128xbf16>, vector<32x128xf32> -> vector<32x128xf32>
    %73 = arith.addf %67, %72 : vector<32x128xf32>
    %c0_69 = arith.constant 0 : index
    %c2_70 = arith.constant 2 : index
    %c0_71 = arith.constant 0 : index
    %74 = vector.load %arg10[%c0_69, %c2_70, %c0_71] : memref<2x18x144xbf16, #tpu.memory_space<vmem>>, vector<2x16x144xbf16>
    %75 = vector.shape_cast %74 : vector<2x16x144xbf16> to vector<32x144xbf16>
    %c2_72 = arith.constant 2 : index
    %c0_73 = arith.constant 0 : index
    %c0_74 = arith.constant 0 : index
    %76 = vector.load %arg2[%c2_72, %c0_73, %c0_74] : memref<3x144x128xbf16, #tpu.memory_space<vmem>>, vector<1x144x128xbf16>
    %77 = vector.shape_cast %76 : vector<1x144x128xbf16> to vector<144x128xbf16>
    %cst_75 = arith.constant dense<0.000000e+00> : vector<32x128xf32>
    %78 = tpu.matmul %75, %77, %cst_75 {dimension_numbers = #tpu.dot_dimension_numbers<[1], [0], [0], [1], [0, 0, 1, 1], [], []>} : vector<32x144xbf16>, vector<144x128xbf16>, vector<32x128xf32> -> vector<32x128xf32>
    %79 = arith.addf %73, %78 : vector<32x128xf32>
    %cst_76 = arith.constant dense<0.000000e+00> : vector<128xf32>
    %80 = vector.multi_reduction <add>, %79, %cst_76 [0] : vector<32x128xf32> to vector<128xf32>
    %81 = vector.shape_cast %80 : vector<128xf32> to vector<1x128xf32>
    %82 = arith.mulf %79, %79 : vector<32x128xf32>
    %cst_77 = arith.constant dense<0.000000e+00> : vector<128xf32>
    %83 = vector.multi_reduction <add>, %82, %cst_77 [0] : vector<32x128xf32> to vector<128xf32>
    %84 = vector.shape_cast %83 : vector<128xf32> to vector<1x128xf32>
    %cst_78 = arith.constant dense<0.000000e+00> : vector<1x8xf32>
    %85 = tpu.matmul %81, %8, %cst_78 {dimension_numbers = #tpu.dot_dimension_numbers<[1], [0], [0], [1], [0, 0, 1, 1], [], []>} : vector<1x128xf32>, vector<128x8xf32>, vector<1x8xf32> -> vector<1x8xf32>
    %cst_79 = arith.constant 5.120000e+02 : f32
    %86 = vector.broadcast %cst_79 : f32 to vector<1x8xf32>
    %87 = arith.divf %85, %86 : vector<1x8xf32>
    %cst_80 = arith.constant dense<0.000000e+00> : vector<1x8xf32>
    %88 = tpu.matmul %84, %8, %cst_80 {dimension_numbers = #tpu.dot_dimension_numbers<[1], [0], [0], [1], [0, 0, 1, 1], [], []>} : vector<1x128xf32>, vector<128x8xf32>, vector<1x8xf32> -> vector<1x8xf32>
    %cst_81 = arith.constant 5.120000e+02 : f32
    %89 = vector.broadcast %cst_81 : f32 to vector<1x8xf32>
    %90 = arith.divf %88, %89 : vector<1x8xf32>
    %91 = arith.mulf %87, %87 : vector<1x8xf32>
    %92 = arith.subf %90, %91 : vector<1x8xf32>
    %c0_82 = arith.constant 0 : index
    %c0_83 = arith.constant 0 : index
    %93 = vector.load %arg7[%c0_82, %c0_83] : memref<1x8xf32, #tpu.memory_space<vmem>>, vector<1x8xf32>
    %cst_84 = arith.constant 9.99999974E-6 : f32
    %94 = vector.broadcast %cst_84 : f32 to vector<1x8xf32>
    %95 = arith.addf %92, %94 : vector<1x8xf32>
    %96 = math.rsqrt %95 : vector<1x8xf32>
    %97 = arith.mulf %93, %96 : vector<1x8xf32>
    %c0_85 = arith.constant 0 : index
    %c0_86 = arith.constant 0 : index
    %98 = vector.load %arg8[%c0_85, %c0_86] : memref<1x8xf32, #tpu.memory_space<vmem>>, vector<1x8xf32>
    %99 = arith.mulf %87, %97 : vector<1x8xf32>
    %100 = arith.subf %98, %99 : vector<1x8xf32>
    %cst_87 = arith.constant dense<0.000000e+00> : vector<1x128xf32>
    %101 = tpu.matmul %97, %9, %cst_87 {dimension_numbers = #tpu.dot_dimension_numbers<[1], [0], [0], [1], [0, 0, 1, 1], [], []>} : vector<1x8xf32>, vector<8x128xf32>, vector<1x128xf32> -> vector<1x128xf32>
    %cst_88 = arith.constant dense<0.000000e+00> : vector<1x128xf32>
    %102 = tpu.matmul %100, %9, %cst_88 {dimension_numbers = #tpu.dot_dimension_numbers<[1], [0], [0], [1], [0, 0, 1, 1], [], []>} : vector<1x8xf32>, vector<8x128xf32>, vector<1x128xf32> -> vector<1x128xf32>
    %103 = vector.shape_cast %5 : vector<2x16x128xf32> to vector<32x128xf32>
    %104 = vector.broadcast %101 : vector<1x128xf32> to vector<32x128xf32>
    %105 = arith.mulf %79, %104 : vector<32x128xf32>
    %106 = vector.broadcast %102 : vector<1x128xf32> to vector<32x128xf32>
    %107 = arith.addf %105, %106 : vector<32x128xf32>
    %108 = arith.addf %107, %103 : vector<32x128xf32>
    %cst_89 = arith.constant 0.000000e+00 : f32
    %109 = vector.broadcast %cst_89 : f32 to vector<32x128xf32>
    %110 = arith.maximumf %108, %109 : vector<32x128xf32>
    %c0_90 = arith.constant 0 : index
    %c0_91 = arith.constant 0 : index
    %111 = vector.load %arg9[%c0_90, %c0_91] : memref<32x128xf32, #tpu.memory_space<vmem>>, vector<32x128xf32>
    tpu.vector_store %arg9[%c0_90, %c0_91], %110 {strides = array<i32>} : memref<32x128xf32, #tpu.memory_space<vmem>>, vector<32x128xf32>,
    return
  }
}

</mosaic_0001>

<bundles_post_ra>
// kernel: tpu_custom_call.1
= control target key start
LH: loop header
LB: loop body
LE: loop exit
PB: predicated region body
PF: predicated region fallthrough
CT: control target
= control target key end

     0   :  { %14 = vsyncpa [#allocation4], 0  ;;  %s3224_s0 = inlined_call_operand.vmem [shape: f32[2,16,128], index: 0, kind: input, shape index: {}]   ;;  %s3225_s1 = inlined_call_operand.hbm [shape: bf16[3,144,128], index: 1, kind: input, shape index: {}]   ;;  %s3226_s2 = inlined_call_operand.hbm [shape: bf16[3,144,128], index: 2, kind: input, shape index: {}]   ;;  %s3227_s3 = inlined_call_operand.vmem [shape: f32[128,8], index: 3, kind: input, shape index: {}]   ;;  %s3228_s4 = inlined_call_operand.vmem [shape: f32[8,128], index: 4, kind: input, shape index: {}]   ;;  %s3229_s5 = inlined_call_operand.vmem [shape: f32[1,8], index: 5, kind: input, shape index: {}]   ;;  %s3230_s6 = inlined_call_operand.vmem [shape: f32[1,8], index: 6, kind: input, shape index: {}]   ;;  %s3231_s7 = inlined_call_operand.vmem [shape: f32[1,8], index: 7, kind: input, shape index: {}]   ;;  %s3232_s8 = inlined_call_operand.vmem [shape: f32[1,8], index: 8, kind: input, shape index: {}]   ;;  %s3233_s9 = inlined_call_operand.hbm [shape: f32[32,128], index: 9, kind: output, shape index: {}]  }
   0x1   :  { %15 = vsyncpa [#allocation7], 0 }
   0x2   :  { %16 = vsyncpa [#allocation5], 0  ;;  %s2607_s30 = smov [#allocation3]   ;;  %s2535_s13 = scalar_lea.hbm %s3225_s1, 3456 }
   0x3   :  { %s24_s10 = sshll.u32 %s2607_s30, 4  ;;  %p2536_p0 = scmp.ne.s32.totalorder %s3225_s1, %s2535_s13  ;;  %s25_s10 = int_to_ptr.vmem [resolvable:$true] %s24_s10 }
   0x4   :  { %p2539_p1 = scmp.lt.u32.totalorder %s2535_s13, %s3225_s1 }
   0x6   :  { %p2541_p2 = pnand %p2539_p1, %p2536_p0 }
   0x8   :  { %2544 = shalt.err (!%p2541_p2)
}
   0x9   :  { %s2545_s18 = scalar_lea.vmem %s25_s10, 3456  ;;  %p2550_p4 = scmp.lt.s32.totalorder %s25_s10, %s25_s10 }
   0xa   :  { %p2546_p3 = scmp.ne.s32.totalorder %s25_s10, %s2545_s18  ;;  %p2551_p5 = scmp.lt.s32.totalorder %s2545_s18, %s2545_s18 }
   0xc   :  { %p2552_p6 = por %p2551_p5, %p2550_p4 }
   0xe   :  { %p2553_p7 = pnand %p2552_p6, %p2546_p3 }
  0x10   :  { %2556 = shalt.err (!%p2553_p7)
}
  0x11   :  { %s2608_s19 = smov 64   ;;  %s2609_s20 = smov 4  }
  0x12   :  { %30 = dma.hbm_to_vmem [thread:$0]  %s3225_s1, 3456, %s25_s10, [#allocation4], %s2608_s19, %s2608_s19, %s2609_s20  }
  0x13   :  { %s2610_s23 = smov [#allocation6]   ;;  %s2557_s27 = scalar_lea.hbm %s3226_s2, 3456 }
  0x14   :  { %s36_s24 = sshll.u32 %s2610_s23, 4  ;;  %p2558_p8 = scmp.ne.s32.totalorder %s3226_s2, %s2557_s27  ;;  %s37_s24 = int_to_ptr.vmem [resolvable:$true] %s36_s24 }
  0x15   :  { %p2561_p9 = scmp.lt.u32.totalorder %s2557_s27, %s3226_s2 }
  0x17   :  { %p2563_p10 = pnand %p2561_p9, %p2558_p8 }
  0x19   :  { %2566 = shalt.err (!%p2563_p10)
}
  0x1a   :  { %s2567_s12 = scalar_lea.vmem %s37_s24, 3456  ;;  %p2572_p12 = scmp.lt.s32.totalorder %s37_s24, %s37_s24 }
  0x1b   :  { %p2568_p11 = scmp.ne.s32.totalorder %s37_s24, %s2567_s12  ;;  %p2573_p13 = scmp.lt.s32.totalorder %s2567_s12, %s2567_s12 }
  0x1d   :  { %p2574_p0 = por %p2573_p13, %p2572_p12 }
  0x1f   :  { %p2575_p1 = pnand %p2574_p0, %p2568_p11 }
  0x21   :  { %2578 = shalt.err (!%p2575_p1)
}
  0x22   :  { %42 = dma.hbm_to_vmem [thread:$0]  %s3226_s2, 3456, %s37_s24, [#allocation7], %s2608_s19, %s2608_s19, %s2609_s20  }
  0x23   :  { %2601 = dma.done.wait [#allocation4], 3456  }
  0x24   :  { %2602 = vsyncadd [#allocation4], 4294963840 }
  0x25   :  { %2603 = dma.done.wait [#allocation7], 3456  }
  0x26   :  { %2604 = vsyncadd [#allocation7], 4294963840  ;;  %v2611_v0 = vmov 0   ;;  %vm86_vm0 = vcmask 125952   ;;  %vm62_vm1 = vcmask 1040384   ;;  %vm65_vm3 = vcmask 126980  }
  0x27   :  { %354 = vmatprep.subr.bf16.mxu0 %v2611_v0  ;;  %88 = vst.msk [vmem:[#allocation2 + $0xc] sm:$0xf] %vm86_vm0, %v2611_v0  ;;  %92 = vst.msk [vmem:[#allocation2 + $0x24] sm:$0xf] %vm86_vm0, %v2611_v0  ;;  %vm63_vm2 = vsmask.f32 256 }
  0x28   :  { %vm66_vm4 = vsmask.f32 4352  ;;  %v2612_v1 = vmov 0.0|0.0   ;;  %vm2699_vm5 = vmand %vm62_vm1, %vm63_vm2  ;;  %vm75_vm6 = vsmask.f32 7938  ;;  %v2467_v3 = vld [vmem:[#allocation3 + $0x48] sm:$0xff]  }
  0x29   :  { %2328 = vmatprep.subr.bf16.mxu1 %v2612_v1  ;;  %vm2703_vm7 = vmand %vm65_vm3, %vm66_vm4  ;;  %vm77_vm8 = vsmask.f32 7954  ;;  %355 = vmatpush1.bf16.msra.mxu0 %v2467_v3  ;;  %v2468_v5 = vld [vmem:[#allocation3 + $0x50] sm:$0xff]   ;;  %v2469_v8 = vld [vmem:[#allocation3 + $0x58] sm:$0xff]   ;;  %vm89_vm13 = vcmask 122880   ;;  %vm152_vm15 = vcmask 1043456  }
  0x2a   :  { %356 = vmatprep.subr.bf16.mxu0 %v2611_v0  ;;  %vm2709_vm9 = vmand %vm62_vm1, %vm75_vm6  ;;  %v2470_v9 = vld [vmem:[#allocation3 + $0x60] sm:$0xff]   ;;  %v69_v10 = vld [vmem:[#allocation2] sm:$0x11]  ;;  %vm110_vm14 = vsmask.f32 4368 }
  0x2b   :  { %vm2713_vm10 = vmand %vm65_vm3, %vm77_vm8  ;;  %v72_v11 = vld [vmem:[#allocation2 + $0x18] sm:$0x11]  ;;  %v80_v12 = vld [vmem:[#allocation2 + $0x10] sm:$0x11]  ;;  %vm210_vm3 = vsmask.f32 7440 }
  0x2c   :  { %vm68_vm11 = vmor %vm2703_vm7, %vm2699_vm5  ;;  %v83_v16 = vld [vmem:[#allocation2 + $0x28] sm:$0x11]  ;;  %v94_v17 = vld [vmem:[%s3224_s0] sm:$0xff]  ;;  %vm536_vm7 = vcmask 1042432   ;;  %vm537_vm8 = vcmask 1046532  }
  0x2d   :  { %357 = vmatpush1.bf16.msra.mxu0 %v2468_v5  ;;  %vm79_vm12 = vmor %vm2713_vm10, %vm2709_vm9  ;;  %v70_v13 = vsel %vm68_vm11, 0, %v69_v10  ;;  %v73_v14 = vsel %vm68_vm11, 0, %v72_v11  ;;  %v95_v19 = vld [vmem:[%s3224_s0 + $0x8] sm:$0xff]  ;;  %v96_v20 = vld [vmem:[%s3224_s0 + $0x10] sm:$0xff]  ;;  %v2084_v21 = vpack.c.bf16 %v94_v17, %v94_v17  ;;  %vm2613_vm10 = vmmov 0  }
  0x2e   :  { %358 = vmatprep.subr.bf16.mxu0 %v2611_v0  ;;  %v81_v15 = vsel %vm79_vm12, 0, %v80_v12  ;;  %71 = vst [vmem:[#allocation2] sm:$0x11] %v70_v13  ;;  %74 = vst [vmem:[#allocation2 + $0x18] sm:$0x11] %v73_v14  ;;  %v84_v18 = vsel %vm79_vm12, 0, %v83_v16  ;;  %v2085_v22 = vpack.c.bf16 %v95_v19, %v95_v19  ;;  %v2086_v23 = vpack.c.bf16 %v96_v20, %v96_v20 }
  0x2f   :  { %82 = vst [vmem:[#allocation2 + $0x10] sm:$0x11] %v81_v15  ;;  %87 = vst.msk [vmem:[#allocation2 + $0x4] sm:$0xf] %vm86_vm0, %v2611_v0  ;;  %v2471_v24 = vld [vmem:[#allocation3 + $0x68] sm:$0xff]   ;;  %v113_v25 = vshrl.u32 %v2084_v21, 16 }
  0x30   :  { %90 = vst.msk [vmem:[#allocation2 + $0x14] sm:$0x1] %vm89_vm13, %v2611_v0  ;;  %85 = vst [vmem:[#allocation2 + $0x28] sm:$0x11] %v84_v18  ;;  %v116_v26 = vshll.u32 %v2084_v21, 16  ;;  %v121_v27 = vshrl.u32 %v2085_v22, 16 }
  0x31   :  { %359 = vmatpush1.bf16.msra.mxu0 %v2469_v8  ;;  %91 = vst.msk [vmem:[#allocation2 + $0x1c] sm:$0xf] %vm86_vm0, %v2611_v0  ;;  %v124_v28 = vshll.u32 %v2085_v22, 16  ;;  %v130_v29 = vshrl.u32 %v2086_v23, 16  ;;  %v133_v30 = vshll.u32 %v2086_v23, 16  ;;  %v115_v31 = vrot.slane %v113_v25, 7  ;;  %vm2756_vm1 = vmand %vm152_vm15, %vm75_vm6 }
  0x32   :  { %360 = vmatprep.subr.bf16.mxu0 %v2611_v0  ;;  %93 = vst.msk [vmem:[#allocation2 + $0x2c] sm:$0x1] %vm89_vm13, %v2611_v0  ;;  %v123_v32 = vrot.slane %v121_v27, 7  ;;  %vm2762_vm0 = vmor %vm63_vm2, %vm110_vm14  ;;  %v2472_v38 = vld [vmem:[#allocation3 + $0x70] sm:$0xff]   ;;  %v97_v49 = vld [vmem:[%s3224_s0 + $0x18] sm:$0xff]  ;;  %vm347_vm6 = vcmask 130048  }
  0x33   :  { %v132_v33 = vrot.slane %v130_v29, 7  ;;  %v118_v36 = vor.u32 %v116_v26, %v115_v31  ;;  %v119_v37 = vrot.slane %v115_v31, 4  ;;  %v2473_v50 = vld [vmem:[#allocation3 + $0x78] sm:$0xff]   ;;  %vm209_vm2 = vsmask.f32 3328  ;;  %v2474_v54 = vld [vmem:[#allocation3 + $0x80] sm:$0xff]   ;;  %vm2862_vm9 = vmor %vm536_vm7, %vm537_vm8 }
  0x34   :  { %v126_v39 = vor.u32 %v124_v28, %v123_v32  ;;  %v128_v40 = vrot.slane %v123_v32, 4  ;;  %v2087_v51 = vpack.c.bf16 %v97_v49, %v97_v49  ;;  %v2475_v4 = vld [vmem:[#allocation3 + $0x88] sm:$0xff]   ;;  %vm2802_vm4 = vmor %vm209_vm2, %vm210_vm3  ;;  %v2476_v27 = vld [vmem:[#allocation3] sm:$0xff]   ;;  %vm873_vm11 = vcmask 64512  }
  0x35   :  { %361 = vmatpush1.bf16.msra.mxu0 %v2470_v9  ;;  %v135_v41 = vor.u32 %v133_v30, %v132_v33  ;;  %v154_v42 = vld [vmem:[#allocation2] sm:$0xf]  ;;  %v161_v45 = vld [vmem:[#allocation2 + $0x18] sm:$0xf]  ;;  %v136_v55 = vrot.slane %v132_v33, 4 }
  0x36   :  { %362 = vmatprep.subr.bf16.mxu0 %v2611_v0  ;;  %v158_v43 = vld [vmem:[#allocation2 + $0x10] sm:$0x1]  ;;  %v155_v44 = vsel %vm2756_vm1, %v118_v36, %v154_v42  ;;  %v127_v46 = vsel %vm2762_vm0, %v119_v37, %v126_v39  ;;  %v138_v52 = vshrl.u32 %v2087_v51, 16  ;;  %v141_v53 = vshll.u32 %v2087_v51, 16  ;;  %v168_v33 = vld [vmem:[%s3227_s3] sm:$0xff]  ;;  %v169_v39 = vld [vmem:[%s3227_s3 + $0x8] sm:$0xff] }
  0x37   :  { %156 = vst [vmem:[#allocation2] sm:$0xf] %v155_v44  ;;  %v159_v47 = vsel %vm2699_vm5, %v128_v40, %v158_v43  ;;  %v162_v48 = vsel %vm2756_vm1, %v135_v41, %v161_v45  ;;  %157 = vst [vmem:[#allocation2 + $0x8] sm:$0xf] %v127_v46  ;;  %v165_v58 = vld [vmem:[#allocation2 + $0x28] sm:$0x1] }
  0x38   :  { %160 = vst [vmem:[#allocation2 + $0x10] sm:$0x1] %v159_v47  ;;  %163 = vst [vmem:[#allocation2 + $0x18] sm:$0xf] %v162_v48  ;;  %v140_v56 = vrot.slane %v138_v52, 7  ;;  %v170_v40 = vld [vmem:[%s3227_s3 + $0x10] sm:$0xff]  ;;  %v2831_v47 = vpack.c.bf16 %v169_v39, %v168_v33 }
  0x39   :  { %363 = vmatpush1.bf16.msra.mxu0 %v2471_v24  ;;  %v171_v44 = vld [vmem:[%s3227_s3 + $0x18] sm:$0xff]  ;;  %v174_v39 = vld [vmem:[%s3227_s3 + $0x30] sm:$0xff] }
  0x3a   :  { %364 = vmatprep.subr.bf16.mxu0 %v2611_v0  ;;  %v143_v63 = vor.u32 %v141_v53, %v140_v56  ;;  %v145_v3 = vrot.slane %v140_v56, 4  ;;  %v2477_v45 = vld [vmem:[#allocation3 + $0x8] sm:$0xff]   ;;  %2330 = vmatpush3.bf16.msra.mxu1 %v2831_v47  ;;  %v2835_v49 = vpack.c.bf16 %v171_v44, %v170_v40 }
  0x3b   :  { %2331 = vmatprep.subr.bf16.mxu1 %v2612_v1  ;;  %v175_v40 = vld [vmem:[%s3227_s3 + $0x38] sm:$0xff] }
  0x3c   :  { %v144_v11 = vsel %vm2762_vm0, %v136_v55, %v143_v63  ;;  %v166_v12 = vsel %vm2699_vm5, %v145_v3, %v165_v58  ;;  %v2482_v63 = vld [vmem:[#allocation3 + $0x30] sm:$0xff]   ;;  %v2483_v3 = vld [vmem:[#allocation3 + $0x38] sm:$0xff]  }
  0x3d   :  { %365 = vmatpush1.bf16.msra.mxu0 %v2472_v38  ;;  %164 = vst [vmem:[#allocation2 + $0x20] sm:$0xf] %v144_v11  ;;  %167 = vst [vmem:[#allocation2 + $0x28] sm:$0x1] %v166_v12 }
  0x3e   :  { %366 = vmatprep.subr.bf16.mxu0 %v2611_v0  ;;  %v2780_v57 = vld [vmem:[#allocation2] sm:$0xff]  ;;  %v2782_v59 = vld [vmem:[#allocation2 + $0x8] sm:$0xff]  ;;  %2333 = vmatpush3.bf16.msra.mxu1 %v2835_v49 }
  0x3f   :  { %v2784_v60 = vld [vmem:[#allocation2 + $0x10] sm:$0x11]  ;;  %v213_v61 = vshrl.u32 %v2780_v57, 16  ;;  %v216_v62 = vshll.u32 %v2780_v57, 16  ;;  %v222_v5 = vshll.u32 %v2782_v59, 16  ;;  %v226_v6 = vshrl.u32 %v2782_v59, 16  ;;  %2334 = vmatprep.subr.bf16.mxu1 %v2612_v1 }
  0x40   :  { %v232_v7 = vshll.u32 %v2784_v60, 16  ;;  %v2791_v8 = vld [vmem:[#allocation2 + $0x18] sm:$0xff]  ;;  %v1998_v58 = vcombine.high %v2780_v57, %v2782_v59  ;;  %v544_v11 = vrot.slane %v2784_v60, 5 }
  0x41   :  { %367 = vmatpush1.bf16.msra.mxu0 %v2473_v50  ;;  %v215_v9 = vrot.slane %v213_v61, 4  ;;  %v218_v10 = vrot.slane %v216_v62, 5  ;;  %v224_v13 = vrot.slane %v222_v5, 5  ;;  %v228_v14 = vrot.slane %v226_v6, 4  ;;  %v2478_v50 = vld [vmem:[#allocation3 + $0x10] sm:$0xff]   ;;  %v2480_v61 = vld [vmem:[#allocation3 + $0x20] sm:$0xff]  }
  0x42   :  { %368 = vmatprep.subr.bf16.mxu0 %v2611_v0  ;;  %v237_v15 = vshrl.u32 %v2791_v8, 16  ;;  %v240_v17 = vshll.u32 %v2791_v8, 16  ;;  %v234_v20 = vrot.slane %v232_v7, 5  ;;  %v2481_v62 = vld [vmem:[#allocation3 + $0x28] sm:$0xff]   ;;  %v541_v5 = vrot.slane %v2782_v59, 5 }
  0x43   :  { %v219_v16 = vor.u32 %v218_v10, %v215_v9  ;;  %v229_v19 = vor.u32 %v228_v14, %v224_v13  ;;  %v530_v6 = vld [vmem:[#allocation2] sm:$0xee]  ;;  %v1997_v7 = vcombine.low %v2780_v57, %v2782_v59  ;;  %v2486_v57 = vld [vmem:[#allocation3 + $0x98] sm:$0xff]   ;;  %v2525_v14 = vld [vmem:[#allocation6 + $0xc8] sm:$0xff]  }
  0x44   :  { %v239_v21 = vrot.slane %v237_v15, 4  ;;  %v242_v23 = vrot.slane %v240_v17, 5  ;;  %v2811_v31 = vld [vmem:[#allocation2 + $0x20] sm:$0xff]  ;;  %v2813_v32 = vld [vmem:[#allocation2 + $0x28] sm:$0x11]  ;;  %v2012_v12 = vrot.slane %v530_v6, 9 }
  0x45   :  { %369 = vmatpush1.bf16.msra.mxu0 %v2474_v54  ;;  %v220_v22 = vrot.slane %v219_v16, 4  ;;  %v230_v24 = vrot.slane %v229_v19, 4  ;;  %v246_v36 = vshll.u32 %v2811_v31, 16  ;;  %v250_v37 = vshrl.u32 %v2811_v31, 16  ;;  %v2479_v54 = vld [vmem:[#allocation3 + $0x18] sm:$0xff]   ;;  %v2485_v9 = vld [vmem:[#allocation3 + $0x90] sm:$0xff]  }
  0x46   :  { %370 = vmatprep.subr.bf16.mxu0 %v2611_v0  ;;  %v243_v28 = vor.u32 %v242_v23, %v239_v21  ;;  %v256_v38 = vshll.u32 %v2813_v32, 16  ;;  %v2000_v10 = vcombine.high %v2791_v8, %v2811_v31  ;;  %v542_v59 = vsel %vm2862_vm9, %v2012_v12, %v541_v5  ;;  %v2487_v16 = vld [vmem:[#allocation3 + $0xa0] sm:$0xff]   ;;  %v2488_v19 = vld [vmem:[#allocation3 + $0xa8] sm:$0xff]   ;;  %v2490_v21 = vld [vmem:[#allocation3 + $0xb8] sm:$0xff]  }
  0x47   :  { %v225_v25 = vsel %vm2802_vm4, %v220_v22, %v224_v13  ;;  %v235_v26 = vsel %vm2802_vm4, %v230_v24, %v234_v20  ;;  %v248_v42 = vrot.slane %v246_v36, 5  ;;  %v252_v43 = vrot.slane %v250_v37, 4  ;;  %v2489_v20 = vld [vmem:[#allocation3 + $0xb0] sm:$0xff]   ;;  %v531_v23 = vld [vmem:[#allocation2 + $0x18] sm:$0xee]  ;;  %v173_v37 = vld [vmem:[%s3227_s3 + $0x28] sm:$0xff] }
  0x48   :  { %v1982_v29 = vcombine.low %v225_v25, %v235_v26  ;;  %v1983_v30 = vcombine.high %v225_v25, %v235_v26  ;;  %v244_v41 = vrot.slane %v243_v28, 4  ;;  %v258_v46 = vrot.slane %v256_v38, 5  ;;  %v2494_v24 = vld [vmem:[#allocation3 + $0xc8] sm:$0xff]   ;;  %v2495_v28 = vld [vmem:[#allocation3 + $0xd0] sm:$0xff]  }
  0x49   :  { %371 = vmatpush1.bf16.msra.mxu0 %v2475_v4  ;;  %v253_v48 = vor.u32 %v252_v43, %v248_v42  ;;  %v2484_v4 = vld [vmem:[#allocation3 + $0x40] sm:$0xff]   ;;  %v543_v13 = vrot.slane %v541_v5, 4  ;;  %v1999_v15 = vcombine.low %v2791_v8, %v2811_v31  ;;  %v548_v22 = vrot.slane %v2811_v31, 5  ;;  %v172_v36 = vld [vmem:[%s3227_s3 + $0x20] sm:$0xff]  ;;  %v177_v43 = vld [vmem:[%s3227_s3 + $0x48] sm:$0xff] }
  0x4a   :  { %481 = vmatprep.subr.bf16.mxu0 %v2611_v0  ;;  %1995 = vmatprep.mubr.msk.bf16.mxu0 %vm347_vm6, %v1983_v30  ;;  %v249_v51 = vsel %vm2802_vm4, %v244_v41, %v248_v42  ;;  %v2491_v8 = vld [vmem:[#allocation3 + $0xc0] sm:$0xff]   ;;  %v2013_v25 = vrot.slane %v531_v23, 9  ;;  %v2900_v38 = vpack.c.bf16 %v173_v37, %v172_v36  ;;  %v2912_v41 = vpack.c.bf16 %v175_v40, %v174_v39  ;;  %v176_v42 = vld [vmem:[%s3227_s3 + $0x40] sm:$0xff] }
  0x4b   :  { %v254_v52 = vrot.slane %v253_v48, 4  ;;  %v545_v60 = vsel %vm2862_vm9, %v543_v13, %v544_v11  ;;  %v550_v26 = vrot.slane %v548_v22, 4  ;;  %v2924_v44 = vpack.c.bf16 %v177_v43, %v176_v42  ;;  %v866_v42 = vld [vmem:[%s3229_s5] sm:$0x1] }
  0x4c   :  { %387 = vmatmul.mubr.bf16.vlgmr.msra.gmra.mrb[0].mxu0 %v1982_v29  ;;  %v2015_v17 = vcombine.high %v542_v59, %v545_v60  ;;  %v549_v29 = vsel %vm2862_vm9, %v2013_v25, %v548_v22  ;;  %v2014_v31 = vcombine.low %v542_v59, %v545_v60  ;;  %2336 = vmatpush3.bf16.msra.mxu1 %v2900_v38 }
  0x4d   :  { %482 = vmatpush1.bf16.msra.mxu0 %v2476_v27  ;;  %v259_v53 = vsel %vm2802_vm4, %v254_v52, %v258_v46  ;;  %v551_v27 = vrot.slane %v2813_v32, 5  ;;  %2337 = vmatprep.subr.bf16.mxu1 %v2612_v1  ;;  %v179_v46 = vld [vmem:[%s3227_s3 + $0x58] sm:$0xff] }
  0x4e   :  { %483 = vmatprep.subr.bf16.mxu0 %v2611_v0  ;;  %v1985_v55 = vcombine.high %v249_v51, %v259_v53  ;;  %v1984_v56 = vcombine.low %v249_v51, %v259_v53  ;;  %v181_v51 = vld [vmem:[%s3227_s3 + $0x68] sm:$0xff]  ;;  %v182_v53 = vld [vmem:[%s3227_s3 + $0x70] sm:$0xff] }
  0x4f   :  { %v552_v30 = vsel %vm2862_vm9, %v550_v26, %v551_v27 }
  0x50   :  { %1996 = vmatprep.mubr.msk.bf16.mxu0 %vm347_vm6, %v1985_v55  ;;  %v2017_v33 = vcombine.high %v549_v29, %v552_v30  ;;  %v2016_v32 = vcombine.low %v549_v29, %v552_v30  ;;  %2339 = vmatpush3.bf16.msra.mxu1 %v2912_v41 }
  0x51   :  { %484 = vmatpush1.bf16.msra.mxu0 %v2477_v45  ;;  %2340 = vmatprep.subr.bf16.mxu1 %v2612_v1  ;;  %v178_v45 = vld [vmem:[%s3227_s3 + $0x50] sm:$0xff] }
  0x52   :  { %485 = vmatprep.subr.bf16.mxu0 %v2611_v0  ;;  %v2936_v48 = vpack.c.bf16 %v179_v46, %v178_v45  ;;  %v870_v46 = vld [vmem:[%s3230_s6] sm:$0x1] }
  0x54   :  { %395 = vmatmul.mubr.bf16.gmra.mrb[4].mxu0 %v1984_v56  ;;  %2342 = vmatpush3.bf16.msra.mxu1 %v2924_v44  ;;  %v2614_v56 = vmov 0.0  }
  0x55   :  { %486 = vmatpush1.bf16.msra.mxu0 %v2478_v50  ;;  %2010 = vmatprep.mubr.msk.bf16.mxu0 %vm347_vm6, %v1998_v58  ;;  %v180_v50 = vld [vmem:[%s3227_s3 + $0x60] sm:$0xff] }
  0x56   :  { %487 = vmatprep.subr.bf16.mxu0 %v2611_v0  ;;  %2343 = vmatprep.subr.bf16.mxu1 %v2612_v1  ;;  %v2948_v52 = vpack.c.bf16 %v181_v51, %v180_v50 }
  0x57   :  { %2200 = vmatprep.mubr.msk.f32.mxu1 %vm2613_vm10, %v2614_v56 }
  0x58   :  { %2345 = vmatpush3.bf16.msra.mxu1 %v2936_v48 }
  0x59   :  { %488 = vmatpush1.bf16.msra.mxu0 %v2479_v54  ;;  %2346 = vmatprep.subr.bf16.mxu1 %v2612_v1  ;;  %v183_v54 = vld [vmem:[%s3227_s3 + $0x78] sm:$0xff] }
  0x5a   :  { %489 = vmatprep.subr.bf16.mxu0 %v2611_v0  ;;  %v2960_v55 = vpack.c.bf16 %v183_v54, %v182_v53  ;;  %v2496_v53 = vld [vmem:[#allocation6 + $0x48] sm:$0xff]   ;;  %v2497_v54 = vld [vmem:[#allocation6 + $0x50] sm:$0xff]  }
  0x5c   :  { %2348 = vmatpush3.bf16.msra.mxu1 %v2948_v52 }
  0x5d   :  { %490 = vmatpush1.bf16.msra.mxu0 %v2480_v61  ;;  %2349 = vmatprep.subr.bf16.mxu1 %v2612_v1 }
  0x5e   :  { %491 = vmatprep.subr.bf16.mxu0 %v2611_v0 }
  0x60   :  { %2351 = vmatpush3.bf16.msra.mxu1 %v2960_v55 }
  0x61   :  { %492 = vmatpush1.bf16.msra.mxu0 %v2481_v62  ;;  %2352 = vmatprep.subr.bf16.mxu1 %v2612_v1 }
  0x62   :  { %493 = vmatprep.subr.bf16.mxu0 %v2611_v0 }
  0x65   :  { %494 = vmatpush1.bf16.msra.mxu0 %v2482_v63 }
  0x66   :  { %495 = vmatprep.subr.bf16.mxu0 %v2611_v0 }
  0x69   :  { %496 = vmatpush1.bf16.msra.mxu0 %v2483_v3 }
  0x6a   :  { %497 = vmatprep.subr.bf16.mxu0 %v2611_v0 }
  0x6d   :  { %498 = vmatpush1.bf16.msra.mxu0 %v2484_v4 }
  0x6e   :  { %646 = vmatprep.subr.bf16.mxu0 %v2611_v0 }
  0x70   :  { %514 = vmatmul.mubr.bf16.vlgmr.msra.gmra.mrb[0].mxu0 %v1997_v7 }
  0x71   :  { %647 = vmatpush1.bf16.msra.mxu0 %v2485_v9  ;;  %2011 = vmatprep.mubr.msk.bf16.mxu0 %vm347_vm6, %v2000_v10 }
  0x72   :  { %648 = vmatprep.subr.bf16.mxu0 %v2611_v0 }
  0x75   :  { %649 = vmatpush1.bf16.msra.mxu0 %v2486_v57 }
  0x76   :  { %650 = vmatprep.subr.bf16.mxu0 %v2611_v0 }
  0x78   :  { %522 = vmatmul.mubr.bf16.gmra.mrb[4].mxu0 %v1999_v15 }
  0x79   :  { %651 = vmatpush1.bf16.msra.mxu0 %v2487_v16  ;;  %2027 = vmatprep.mubr.msk.bf16.mxu0 %vm347_vm6, %v2015_v17 }
  0x7a   :  { %652 = vmatprep.subr.bf16.mxu0 %v2611_v0 }
  0x7d   :  { %653 = vmatpush1.bf16.msra.mxu0 %v2488_v19 }
  0x7e   :  { %654 = vmatprep.subr.bf16.mxu0 %v2611_v0 }
  0x81   :  { %655 = vmatpush1.bf16.msra.mxu0 %v2489_v20 }
  0x82   :  { %656 = vmatprep.subr.bf16.mxu0 %v2611_v0 }
  0x85   :  { %657 = vmatpush1.bf16.msra.mxu0 %v2490_v21 }
  0x86   :  { %658 = vmatprep.subr.bf16.mxu0 %v2611_v0 }
  0x89   :  { %659 = vmatpush1.bf16.msra.mxu0 %v2491_v8 }
  0x8a   :  { %660 = vmatprep.subr.bf16.mxu0 %v2611_v0 }
  0x8d   :  { %661 = vmatpush1.bf16.msra.mxu0 %v2494_v24 }
  0x8e   :  { %662 = vmatprep.subr.bf16.mxu0 %v2611_v0 }
  0x91   :  { %663 = vmatpush1.bf16.msra.mxu0 %v2495_v28  ;;  %v3013_v28 = vld [vmem:[%s3228_s4] sm:$0xff] }
  0x92   :  { %2376 = vmatprep.subr.bf16.mxu0 %v2612_v1 }
  0x94   :  { %679 = vmatmul.mubr.bf16.vlgmr.msra.gmra.mrb[0].mxu0 %v2014_v31 }
  0x95   :  { %2028 = vmatprep.mubr.msk.bf16.mxu0 %vm347_vm6, %v2017_v33  ;;  %2378 = vmatpush3.bf16.msra.mxu0 %v2831_v47 }
  0x96   :  { %2379 = vmatprep.subr.bf16.mxu0 %v2612_v1 }
  0x99   :  { %2381 = vmatpush3.bf16.msra.mxu0 %v2835_v49 }
  0x9a   :  { %2382 = vmatprep.subr.bf16.mxu0 %v2612_v1 }
  0x9c   :  { %687 = vmatmul.mubr.bf16.gmra.mrb[4].mxu0 %v2016_v32 }
  0x9d   :  { %2384 = vmatpush3.bf16.msra.mxu0 %v2900_v38  ;;  %2280 = vmatprep.mubr.msk.f32.mxu0 %vm2613_vm10, %v2614_v56 }
  0x9e   :  { %2385 = vmatprep.subr.bf16.mxu0 %v2612_v1 }
  0xa1   :  { %2387 = vmatpush3.bf16.msra.mxu0 %v2912_v41 }
  0xa2   :  { %2388 = vmatprep.subr.bf16.mxu0 %v2612_v1 }
  0xa5   :  { %2390 = vmatpush3.bf16.msra.mxu0 %v2924_v44 }
  0xa6   :  { %2391 = vmatprep.subr.bf16.mxu0 %v2612_v1 }
  0xa9   :  { %2393 = vmatpush3.bf16.msra.mxu0 %v2936_v48 }
  0xaa   :  { %2394 = vmatprep.subr.bf16.mxu0 %v2612_v1 }
  0xad   :  { %2396 = vmatpush3.bf16.msra.mxu0 %v2948_v52 }
  0xae   :  { %2397 = vmatprep.subr.bf16.mxu0 %v2612_v1 }
  0xb1   :  { %2399 = vmatpush3.bf16.msra.mxu0 %v2960_v55 }
  0xb2   :  { %2400 = vmatprep.subr.bf16.mxu0 %v2612_v1 }
 0x167   :  { %v2970_v58 = vpop.f32.mrb[0].mxu0 }
 0x168   :  { %v682_v61 = vpop.f32.mrb[1].mxu0  ;;  %v708_v63 = vmul.f32 %v2970_v58, %v2970_v58 }
 0x169   :  { %v2972_v62 = vpop.f32.mrb[2].mxu0  ;;  %v2498_v61 = vld [vmem:[#allocation6 + $0x58] sm:$0xff]  }
 0x16a   :  { %v699_v3 = vadd.f32 %v2972_v62, %v2970_v58  ;;  %v709_v4 = vmul.f32 %v2972_v62, %v2972_v62  ;;  %v685_v5 = vpop.f32.mrb[3].mxu0 }
 0x16b   :  { %v2502_v5 = vld [vmem:[#allocation6 + $0x78] sm:$0xff]  }
 0x16c   :  { %v712_v6 = vadd.f32 %v709_v4, %v708_v63  ;;  %v2499_v63 = vld [vmem:[#allocation6 + $0x60] sm:$0xff]   ;;  %v2501_v4 = vld [vmem:[#allocation6 + $0x70] sm:$0xff]  }
 0x16f   :  { %v2980_v7 = vpop.f32.mrb[4].mxu0 }
 0x170   :  { %v700_v9 = vadd.f32 %v699_v3, %v2980_v7  ;;  %v710_v10 = vmul.f32 %v2980_v7, %v2980_v7  ;;  %v690_v11 = vpop.f32.mrb[5].mxu0  ;;  %v2500_v3 = vld [vmem:[#allocation6 + $0x68] sm:$0xff]  }
 0x171   :  { %v2985_v12 = vpop.f32.mrb[6].mxu0 }
 0x172   :  { %v713_v13 = vadd.f32 %v712_v6, %v710_v10  ;;  %v701_v57 = vadd.f32 %v700_v9, %v2985_v12  ;;  %v711_v59 = vmul.f32 %v2985_v12, %v2985_v12  ;;  %v693_v60 = vpop.f32.mrb[7].mxu0  ;;  %v2503_v6 = vld [vmem:[#allocation6 + $0x80] sm:$0xff]   ;;  %v2504_v9 = vld [vmem:[#allocation6 + $0x88] sm:$0xff]   ;;  %v1020_v10 = vlaneseq }
 0x174   :  { %v702_v15 = vrot.slane %v701_v57, 4  ;;  %v714_v16 = vadd.f32 %v713_v13, %v711_v59  ;;  %v1021_v11 = vshrl.u32 %v1020_v10, 7 }
 0x176   :  { %v703_v17 = vadd.f32 %v702_v15, %v701_v57  ;;  %v715_v22 = vrot.slane %v714_v16, 4  ;;  %v3038_v13 = vsub.s32 0, %v1021_v11 }
 0x178   :  { %v704_v19 = vrot.slane %v703_v17, 2  ;;  %v716_v23 = vadd.f32 %v715_v22, %v714_v16 }
 0x17a   :  { %v705_v20 = vadd.f32 %v704_v19, %v703_v17  ;;  %v717_v24 = vrot.slane %v716_v23, 2 }
 0x17c   :  { %v706_v21 = vrot.slane %v705_v20, 1  ;;  %v718_v25 = vadd.f32 %v717_v24, %v716_v23 }
 0x17e   :  { %v707_v8 = vadd.f32 %v706_v21, %v705_v20  ;;  %v719_v26 = vrot.slane %v718_v25, 1 }
 0x180   :  { %2201 = vmatmul.mubr.f32.vlgmr.msra.gmra.mrb[0].mxu1 %v707_v8  ;;  %v720_v27 = vadd.f32 %v719_v26, %v718_v25 }
 0x181   :  { %2354 = vmatpush3.bf16.msra.mxu1 %v2831_v47  ;;  %2235 = vmatprep.mubr.msk.f32.mxu1 %vm2613_vm10, %v2614_v56 }
 0x182   :  { %2355 = vmatprep.subr.bf16.mxu1 %v2612_v1 }
 0x185   :  { %2357 = vmatpush3.bf16.msra.mxu1 %v2835_v49 }
 0x186   :  { %2358 = vmatprep.subr.bf16.mxu1 %v2612_v1 }
 0x189   :  { %2360 = vmatpush3.bf16.msra.mxu1 %v2900_v38 }
 0x18a   :  { %2361 = vmatprep.subr.bf16.mxu1 %v2612_v1 }
 0x18d   :  { %2363 = vmatpush3.bf16.msra.mxu1 %v2912_v41 }
 0x18e   :  { %2364 = vmatprep.subr.bf16.mxu1 %v2612_v1 }
 0x191   :  { %2366 = vmatpush3.bf16.msra.mxu1 %v2924_v44 }
 0x192   :  { %2367 = vmatprep.subr.bf16.mxu1 %v2612_v1 }
 0x195   :  { %2369 = vmatpush3.bf16.msra.mxu1 %v2936_v48 }
 0x196   :  { %2370 = vmatprep.subr.bf16.mxu1 %v2612_v1 }
 0x199   :  { %2372 = vmatpush3.bf16.msra.mxu1 %v2948_v52 }
 0x19a   :  { %2373 = vmatprep.subr.bf16.mxu1 %v2612_v1 }
 0x19d   :  { %2375 = vmatpush3.bf16.msra.mxu1 %v2960_v55 }
 0x19e   :  { %2238 = vmatprep.subr.mxu1 %v2614_v56 }
 0x1a0   :  { %2236 = vmatmul.mubr.f32.vlgmr.msra.gmra.mrb[2].mxu1 %v720_v27 }
 0x1a1   :  { %2240 = vmatprep.mubr.msk.f32.mxu1 %vm2613_vm10, %v2614_v56  ;;  %2239 = vmatpush3.msra.mxu1 %v3013_v28 }
 0x1a2   :  { %2243 = vmatprep.subr.mxu1 %v2614_v56 }
 0x253   :  { %v787_v29 = vpop.f32.mrb[0].mxu1 }
 0x254   :  { %v2202_v30 = vpop.f32.mrb[1].mxu1  ;;  %v792_v31 = vmul.f32 0.001953125, %v787_v29 }
 0x256   :  { %v864_v32 = vmul.f32 %v792_v31, %v792_v31 }
 0x273   :  { %v859_v33 = vpop.f32.mrb[2].mxu1 }
 0x274   :  { %v863_v36 = vmul.f32 0.001953125, %v859_v33  ;;  %v2237_v37 = vpop.f32.mrb[3].mxu1 }
 0x276   :  { %v865_v39 = vsub.f32 %v863_v36, %v864_v32 }
 0x278   :  { %v867_v40 = vadd.f32 1e-05, %v865_v39 }
 0x27a   :  { %2527 = vrsqrt.f32 %v867_v40 }
 0x284   :  { %v2528_v43 = vpop.eup %2527 }
 0x285   :  { %v869_v45 = vmul.f32 %v2528_v43, %v866_v42  ;;  %v1092_v43 = vld [vmem:[#allocation2] sm:$0xf] }
 0x287   :  { %2241 = vmatmul.mubr.msk.f32.vlgmr.msra.gmra.mrb[4].mxu1 %vm873_vm11, %v869_v45  ;;  %v871_v50 = vmul.f32 %v869_v45, %v792_v31 }
 0x288   :  { %2244 = vmatpush3.msra.mxu1 %v3013_v28  ;;  %2245 = vmatprep.mubr.msk.f32.mxu1 %vm2613_vm10, %v2614_v56 }
 0x289   :  { %v872_v51 = vsub.f32 %v870_v46, %v871_v50  ;;  %1271 = vmatprep.subr.bf16.mxu1 %v2611_v0 }
 0x28b   :  { %2246 = vmatmul.mubr.msk.f32.vlgmr.msra.gmra.mrb[6].mxu1 %vm873_vm11, %v872_v51 }
 0x28c   :  { %1272 = vmatpush1.bf16.msra.mxu1 %v2496_v53  ;;  %v1096_v53 = vld [vmem:[#allocation2 + $0x10] sm:$0x1] }
 0x28d   :  { %1273 = vmatprep.subr.bf16.mxu1 %v2611_v0 }
 0x290   :  { %1274 = vmatpush1.bf16.msra.mxu1 %v2497_v54 }
 0x291   :  { %1275 = vmatprep.subr.bf16.mxu1 %v2611_v0 }
 0x294   :  { %1276 = vmatpush1.bf16.msra.mxu1 %v2498_v61 }
 0x295   :  { %1277 = vmatprep.subr.bf16.mxu1 %v2611_v0 }
 0x298   :  { %1278 = vmatpush1.bf16.msra.mxu1 %v2499_v63 }
 0x299   :  { %1279 = vmatprep.subr.bf16.mxu1 %v2611_v0 }
 0x29c   :  { %1280 = vmatpush1.bf16.msra.mxu1 %v2500_v3 }
 0x29d   :  { %1281 = vmatprep.subr.bf16.mxu1 %v2611_v0 }
 0x2a0   :  { %1282 = vmatpush1.bf16.msra.mxu1 %v2501_v4  ;;  %v1099_v4 = vld [vmem:[#allocation2 + $0x18] sm:$0xf] }
 0x2a1   :  { %1283 = vmatprep.subr.bf16.mxu1 %v2611_v0 }
 0x2a4   :  { %1284 = vmatpush1.bf16.msra.mxu1 %v2502_v5  ;;  %v1103_v5 = vld [vmem:[#allocation2 + $0x28] sm:$0x1] }
 0x2a5   :  { %1285 = vmatprep.subr.bf16.mxu1 %v2611_v0 }
 0x2a8   :  { %1286 = vmatpush1.bf16.msra.mxu1 %v2503_v6 }
 0x2a9   :  { %1287 = vmatprep.subr.bf16.mxu1 %v2611_v0 }
 0x2ac   :  { %1288 = vmatpush1.bf16.msra.mxu1 %v2504_v9 }
 0x2ad   :  { %1398 = vmatprep.subr.bf16.mxu1 %v2611_v0 }
 0x35a   :  { %v943_v57 = vpop.f32.mrb[4].mxu1 }
 0x35b   :  { %v1023_v59 = vrot.slane %v943_v57, %v3038_v13  ;;  %v2242_v60 = vpop.f32.mrb[5].mxu1 }
 0x35d   :  { %v1024_v15 = vmul.f32 %v1023_v59, %v2970_v58  ;;  %v1025_v16 = vmul.f32 %v1023_v59, %v2972_v62  ;;  %v1026_v17 = vmul.f32 %v1023_v59, %v2980_v7  ;;  %v1027_v19 = vmul.f32 %v1023_v59, %v2985_v12 }
 0x35e   :  { %v1016_v20 = vpop.f32.mrb[6].mxu1 }
 0x35f   :  { %v1031_v21 = vrot.slane %v1016_v20, %v3038_v13  ;;  %v2247_v8 = vpop.f32.mrb[7].mxu1 }
 0x361   :  { %v1032_v22 = vadd.f32 %v1031_v21, %v1024_v15  ;;  %v1033_v23 = vadd.f32 %v1031_v21, %v1025_v16  ;;  %v1034_v24 = vadd.f32 %v1031_v21, %v1026_v17  ;;  %v1035_v25 = vadd.f32 %v1031_v21, %v1027_v19 }
 0x363   :  { %v1036_v26 = vmax.f32 %v1032_v22, 0.0  ;;  %v1037_v27 = vmax.f32 %v1033_v23, 0.0  ;;  %v1038_v29 = vmax.f32 %v1034_v24, 0.0  ;;  %v1039_v30 = vmax.f32 %v1035_v25, 0.0 }
 0x365   :  { %v2088_v31 = vpack.c.bf16 %v1036_v26, %v1036_v26  ;;  %v2089_v58 = vpack.c.bf16 %v1037_v27, %v1037_v27  ;;  %v2090_v33 = vpack.c.bf16 %v1038_v29, %v1038_v29  ;;  %v2091_v62 = vpack.c.bf16 %v1039_v30, %v1039_v30 }
 0x367   :  { %v1053_v32 = vshrl.u32 %v2088_v31, 16  ;;  %v1061_v7 = vshrl.u32 %v2089_v58, 16  ;;  %v1070_v36 = vshrl.u32 %v2090_v33, 16  ;;  %v1078_v12 = vshrl.u32 %v2091_v62, 16 }
 0x368   :  { %v1056_v39 = vshll.u32 %v2088_v31, 16  ;;  %v1064_v42 = vshll.u32 %v2089_v58, 16  ;;  %v1073_v46 = vshll.u32 %v2090_v33, 16  ;;  %v1081_v51 = vshll.u32 %v2091_v62, 16 }
 0x369   :  { %v1055_v37 = vrot.slane %v1053_v32, 7  ;;  %v1063_v40 = vrot.slane %v1061_v7, 7  ;;  %v1072_v45 = vrot.slane %v1070_v36, 7  ;;  %v1080_v50 = vrot.slane %v1078_v12, 7 }
 0x36b   :  { %v1058_v54 = vor.u32 %v1056_v39, %v1055_v37  ;;  %v1059_v61 = vrot.slane %v1055_v37, 4  ;;  %v1066_v63 = vor.u32 %v1064_v42, %v1063_v40  ;;  %v1068_v3 = vrot.slane %v1063_v40, 4 }
 0x36c   :  { %v1075_v6 = vor.u32 %v1073_v46, %v1072_v45  ;;  %v1076_v9 = vrot.slane %v1072_v45, 4  ;;  %v1083_v10 = vor.u32 %v1081_v51, %v1080_v50  ;;  %v1085_v11 = vrot.slane %v1080_v50, 4 }
 0x36d   :  { %v1067_v57 = vsel %vm2762_vm0, %v1059_v61, %v1066_v63  ;;  %v1093_v59 = vsel %vm2756_vm1, %v1058_v54, %v1092_v43  ;;  %v1097_v60 = vsel %vm2699_vm5, %v1068_v3, %v1096_v53 }
 0x36e   :  { %v1084_v15 = vsel %vm2762_vm0, %v1076_v9, %v1083_v10  ;;  %1094 = vst [vmem:[#allocation2] sm:$0xf] %v1093_v59  ;;  %1095 = vst [vmem:[#allocation2 + $0x8] sm:$0xf] %v1067_v57  ;;  %v1100_v16 = vsel %vm2756_vm1, %v1075_v6, %v1099_v4  ;;  %v1104_v17 = vsel %vm2699_vm5, %v1085_v11, %v1103_v5  ;;  %v2505_v4 = vld [vmem:[#allocation6] sm:$0xff]  }
 0x36f   :  { %1098 = vst [vmem:[#allocation2 + $0x10] sm:$0x1] %v1097_v60  ;;  %1101 = vst [vmem:[#allocation2 + $0x18] sm:$0xf] %v1100_v16  ;;  %v2506_v16 = vld [vmem:[#allocation6 + $0x8] sm:$0xff]  }
 0x370   :  { %1102 = vst [vmem:[#allocation2 + $0x20] sm:$0xf] %v1084_v15  ;;  %1105 = vst [vmem:[#allocation2 + $0x28] sm:$0x1] %v1104_v17 }
 0x375   :  { %v3058_v19 = vld [vmem:[#allocation2] sm:$0xff]  ;;  %v3060_v20 = vld [vmem:[#allocation2 + $0x8] sm:$0xff] }
 0x376   :  { %v3062_v21 = vld [vmem:[#allocation2 + $0x10] sm:$0x11]  ;;  %v1131_v35 = vshrl.u32 %v3058_v19, 16  ;;  %v1134_v8 = vshll.u32 %v3058_v19, 16  ;;  %v1140_v22 = vshll.u32 %v3060_v20, 16  ;;  %v1144_v34 = vshrl.u32 %v3060_v20, 16 }
 0x377   :  { %v3068_v23 = vld [vmem:[#allocation2 + $0x18] sm:$0xff]  ;;  %v3070_v2 = vld [vmem:[#allocation2 + $0x20] sm:$0xff]  ;;  %v1150_v24 = vshll.u32 %v3062_v21, 16  ;;  %v1129_v33 = vld [vmem:[#allocation2 + $0x28] sm:$0x11] }
 0x378   :  { %v1155_v25 = vshrl.u32 %v3068_v23, 16  ;;  %v1158_v26 = vshll.u32 %v3068_v23, 16  ;;  %v1164_v27 = vshll.u32 %v3070_v2, 16  ;;  %v1133_v29 = vrot.slane %v1131_v35, 4  ;;  %v1448_v51 = vld [vmem:[#allocation2 + $0x18] sm:$0xee] }
 0x379   :  { %v1136_v30 = vrot.slane %v1134_v8, 5  ;;  %v1142_v31 = vrot.slane %v1140_v22, 5  ;;  %v1146_v58 = vrot.slane %v1144_v34, 4  ;;  %v1168_v37 = vshrl.u32 %v3070_v2, 16  ;;  %v2507_v22 = vld [vmem:[#allocation6 + $0x10] sm:$0xff]  }
 0x37a   :  { %v1157_v62 = vrot.slane %v1155_v25, 4  ;;  %v1160_v32 = vrot.slane %v1158_v26, 5  ;;  %v1166_v12 = vrot.slane %v1164_v27, 5  ;;  %v1174_v40 = vshll.u32 %v1129_v33, 16  ;;  %v2509_v25 = vld [vmem:[#allocation6 + $0x18] sm:$0xff]   ;;  %v2510_v26 = vld [vmem:[#allocation6 + $0x20] sm:$0xff]  }
 0x37b   :  { %v1137_v7 = vor.u32 %v1136_v30, %v1133_v29  ;;  %v1147_v36 = vor.u32 %v1146_v58, %v1142_v31  ;;  %v1152_v45 = vrot.slane %v1150_v24, 5  ;;  %v1170_v46 = vrot.slane %v1168_v37, 4  ;;  %v2511_v27 = vld [vmem:[#allocation6 + $0x28] sm:$0xff]   ;;  %v2512_v29 = vld [vmem:[#allocation6 + $0x30] sm:$0xff]   ;;  %v2513_v30 = vld [vmem:[#allocation6 + $0x38] sm:$0xff]  }
 0x37c   :  { %v1161_v39 = vor.u32 %v1160_v32, %v1157_v62  ;;  %v1176_v5 = vrot.slane %v1174_v40, 5  ;;  %v2066_v10 = vrot.slane %v1448_v51, 9  ;;  %v1462_v11 = vrot.slane %v3070_v2, 5 }
 0x37d   :  { %v1138_v42 = vrot.slane %v1137_v7, 4  ;;  %v1148_v43 = vrot.slane %v1147_v36, 4  ;;  %v1171_v61 = vor.u32 %v1170_v46, %v1166_v12  ;;  %v1465_v60 = vrot.slane %v1129_v33, 5  ;;  %v2517_v33 = vld [vmem:[#allocation6 + $0x90] sm:$0xff]   ;;  %v1447_v7 = vld [vmem:[#allocation2] sm:$0xee] }
 0x37e   :  { %v1162_v50 = vrot.slane %v1161_v39, 4  ;;  %v1464_v59 = vrot.slane %v1462_v11, 4  ;;  %v3090_v17 = vsel %vm2862_vm9, %v2066_v10, %v1462_v11  ;;  %v2051_v24 = vcombine.high %v3058_v19, %v3060_v20  ;;  %v2523_v46 = vld [vmem:[#allocation6 + $0xb8] sm:$0xff]  }
 0x37f   :  { %v1143_v53 = vsel %vm2802_vm4, %v1138_v42, %v1142_v31  ;;  %v1153_v54 = vsel %vm2802_vm4, %v1148_v43, %v1152_v45  ;;  %v1172_v9 = vrot.slane %v1171_v61, 4  ;;  %v2514_v31 = vld [vmem:[#allocation6 + $0x40] sm:$0xff]   ;;  %v1455_v58 = vrot.slane %v3060_v20, 5  ;;  %v2521_v45 = vld [vmem:[#allocation6 + $0xa8] sm:$0xff]  }
 0x380   :  { %v2036_v63 = vcombine.high %v1143_v53, %v1153_v54  ;;  %v2035_v3 = vcombine.low %v1143_v53, %v1153_v54  ;;  %v1167_v6 = vsel %vm2802_vm4, %v1162_v50, %v1166_v12  ;;  %v3094_v35 = vsel %vm2862_vm9, %v1464_v59, %v1465_v60  ;;  %v2518_v12 = vld [vmem:[#allocation6 + $0x98] sm:$0xff]  }
 0x381   :  { %v1177_v57 = vsel %vm2802_vm4, %v1172_v9, %v1176_v5  ;;  %v2070_v18 = vcombine.high %v3090_v17, %v3094_v35  ;;  %v2069_v8 = vcombine.low %v3090_v17, %v3094_v35  ;;  %v2050_v62 = vcombine.low %v3058_v19, %v3060_v20  ;;  %v2520_v20 = vld [vmem:[#allocation6 + $0xa0] sm:$0xff]  }
 0x382   :  { %2048 = vmatprep.mubr.msk.bf16.mxu1 %vm347_vm6, %v2036_v63  ;;  %v2038_v15 = vcombine.high %v1167_v6, %v1177_v57  ;;  %v2037_v34 = vcombine.low %v1167_v6, %v1177_v57  ;;  %v2053_v32 = vcombine.high %v3068_v23, %v3070_v2  ;;  %v1457_v36 = vrot.slane %v1455_v58, 4 }
 0x383   :  { %1304 = vmatmul.mubr.bf16.vlgmr.msra.gmra.mrb[8].mxu1 %v2035_v3  ;;  %v2065_v37 = vrot.slane %v1447_v7, 9  ;;  %v1458_v39 = vrot.slane %v3062_v21, 5  ;;  %v2052_v40 = vcombine.low %v3068_v23, %v3070_v2  ;;  %v2522_v21 = vld [vmem:[#allocation6 + $0xb0] sm:$0xff]   ;;  %v2524_v23 = vld [vmem:[#allocation6 + $0xc0] sm:$0xff]  }
 0x384   :  { %1399 = vmatpush1.bf16.msra.mxu1 %v2505_v4  ;;  %2049 = vmatprep.mubr.msk.bf16.mxu1 %vm347_vm6, %v2038_v15  ;;  %v2526_v2 = vld [vmem:[#allocation6 + $0xd0] sm:$0xff]  }
 0x385   :  { %1400 = vmatprep.subr.bf16.mxu1 %v2611_v0  ;;  %v1459_v19 = vsel %vm2862_vm9, %v1457_v36, %v1458_v39  ;;  %v1456_v42 = vsel %vm2862_vm9, %v2065_v37, %v1455_v58 }
 0x386   :  { %v2068_v43 = vcombine.high %v1456_v42, %v1459_v19  ;;  %v2067_v50 = vcombine.low %v1456_v42, %v1459_v19 }
 0x388   :  { %1401 = vmatpush1.bf16.msra.mxu1 %v2506_v16 }
 0x389   :  { %1402 = vmatprep.subr.bf16.mxu1 %v2611_v0 }
 0x38b   :  { %1312 = vmatmul.mubr.bf16.gmra.mrb[12].mxu1 %v2037_v34 }
 0x38c   :  { %1403 = vmatpush1.bf16.msra.mxu1 %v2507_v22  ;;  %2063 = vmatprep.mubr.msk.bf16.mxu1 %vm347_vm6, %v2051_v24 }
 0x38d   :  { %1404 = vmatprep.subr.bf16.mxu1 %v2611_v0 }
 0x390   :  { %1405 = vmatpush1.bf16.msra.mxu1 %v2509_v25 }
 0x391   :  { %1406 = vmatprep.subr.bf16.mxu1 %v2611_v0 }
 0x394   :  { %1407 = vmatpush1.bf16.msra.mxu1 %v2510_v26 }
 0x395   :  { %1408 = vmatprep.subr.bf16.mxu1 %v2611_v0 }
 0x398   :  { %1409 = vmatpush1.bf16.msra.mxu1 %v2511_v27 }
 0x399   :  { %1410 = vmatprep.subr.bf16.mxu1 %v2611_v0 }
 0x39c   :  { %1411 = vmatpush1.bf16.msra.mxu1 %v2512_v29 }
 0x39d   :  { %1412 = vmatprep.subr.bf16.mxu1 %v2611_v0 }
 0x3a0   :  { %1413 = vmatpush1.bf16.msra.mxu1 %v2513_v30 }
 0x3a1   :  { %1414 = vmatprep.subr.bf16.mxu1 %v2611_v0 }
 0x3a4   :  { %1415 = vmatpush1.bf16.msra.mxu1 %v2514_v31  ;;  %v1779_v31 = vld [vmem:[%s3231_s7] sm:$0x1]  ;;  %s2615_s7 = smov [#allocation8]  }
 0x3a5   :  { %1560 = vmatprep.subr.bf16.mxu1 %v2611_v0 }
 0x3a7   :  { %1431 = vmatmul.mubr.bf16.vlgmr.msra.gmra.mrb[8].mxu1 %v2050_v62  ;;  %v1783_v62 = vld [vmem:[%s3232_s8] sm:$0x1]  ;;  %s1965_s8 = sshll.u32 %s2615_s7, 4  ;;  %s1966_s8 = int_to_ptr.vmem [resolvable:$true] %s1965_s8 }
 0x3a8   :  { %2064 = vmatprep.mubr.msk.bf16.mxu1 %vm347_vm6, %v2053_v32  ;;  %1561 = vmatpush1.bf16.msra.mxu1 %v2517_v33  ;;  %s2579_s20 = scalar_lea.vmem %s1966_s8, 512  ;;  %p2584_p3 = scmp.lt.s32.totalorder %s1966_s8, %s1966_s8 }
 0x3a9   :  { %1562 = vmatprep.subr.bf16.mxu1 %v2611_v0  ;;  %p2580_p2 = scmp.ne.s32.totalorder %s1966_s8, %s2579_s20  ;;  %p2585_p4 = scmp.lt.s32.totalorder %s2579_s20, %s2579_s20 }
 0x3ab   :  { %p2586_p5 = por %p2585_p4, %p2584_p3 }
 0x3ac   :  { %1563 = vmatpush1.bf16.msra.mxu1 %v2518_v12 }
 0x3ad   :  { %1564 = vmatprep.subr.bf16.mxu1 %v2611_v0  ;;  %p2587_p6 = pnand %p2586_p5, %p2580_p2 }
 0x3af   :  { %1439 = vmatmul.mubr.bf16.gmra.mrb[12].mxu1 %v2052_v40 }
 0x3b0   :  { %1565 = vmatpush1.bf16.msra.mxu1 %v2520_v20  ;;  %2080 = vmatprep.mubr.msk.bf16.mxu1 %vm347_vm6, %v2068_v43 }
 0x3b1   :  { %1566 = vmatprep.subr.bf16.mxu1 %v2611_v0 }
 0x3b4   :  { %1567 = vmatpush1.bf16.msra.mxu1 %v2521_v45 }
 0x3b5   :  { %1568 = vmatprep.subr.bf16.mxu1 %v2611_v0 }
 0x3b8   :  { %1569 = vmatpush1.bf16.msra.mxu1 %v2522_v21 }
 0x3b9   :  { %1570 = vmatprep.subr.bf16.mxu1 %v2611_v0 }
 0x3bc   :  { %1571 = vmatpush1.bf16.msra.mxu1 %v2523_v46 }
 0x3bd   :  { %1572 = vmatprep.subr.bf16.mxu1 %v2611_v0 }
 0x3c0   :  { %1573 = vmatpush1.bf16.msra.mxu1 %v2524_v23  ;;  %v2531_v23 = vld [vmem:[%s3224_s0] sm:$0xff] }
 0x3c1   :  { %1574 = vmatprep.subr.bf16.mxu1 %v2611_v0 }
 0x3c4   :  { %1575 = vmatpush1.bf16.msra.mxu1 %v2525_v14 }
 0x3c5   :  { %1576 = vmatprep.subr.bf16.mxu1 %v2611_v0 }
 0x3c8   :  { %1577 = vmatpush1.bf16.msra.mxu1 %v2526_v2  ;;  %v2532_v2 = vld [vmem:[%s3224_s0 + $0x8] sm:$0xff] }
 0x3cb   :  { %1593 = vmatmul.mubr.bf16.vlgmr.msra.gmra.mrb[8].mxu1 %v2067_v50 }
 0x3cc   :  { %2081 = vmatprep.mubr.msk.bf16.mxu1 %vm347_vm6, %v2070_v18 }
 0x3d3   :  { %1601 = vmatmul.mubr.bf16.gmra.mrb[12].mxu1 %v2069_v8 }
 0x49e   :  { %v3141_v51 = vpop.f32.mrb[8].mxu1 }
 0x49f   :  { %v1596_v53 = vpop.f32.mrb[9].mxu1  ;;  %v1622_v0 = vmul.f32 %v3141_v51, %v3141_v51 }
 0x4a0   :  { %v3143_v54 = vpop.f32.mrb[10].mxu1  ;;  %v2534_v53 = vld [vmem:[%s3224_s0 + $0x18] sm:$0xff] }
 0x4a1   :  { %v1613_v61 = vadd.f32 %v3143_v54, %v3141_v51  ;;  %v1623_v63 = vmul.f32 %v3143_v54, %v3143_v54  ;;  %v1599_v3 = vpop.f32.mrb[11].mxu1 }
 0x4a3   :  { %v1626_v4 = vadd.f32 %v1623_v63, %v1622_v0 }
 0x4a6   :  { %v3151_v5 = vpop.f32.mrb[12].mxu1 }
 0x4a7   :  { %v1614_v6 = vadd.f32 %v1613_v61, %v3151_v5  ;;  %v1624_v9 = vmul.f32 %v3151_v5, %v3151_v5  ;;  %v1604_v10 = vpop.f32.mrb[13].mxu1 }
 0x4a8   :  { %v3156_v11 = vpop.f32.mrb[14].mxu1 }
 0x4a9   :  { %v1627_v57 = vadd.f32 %v1626_v4, %v1624_v9  ;;  %v1615_v59 = vadd.f32 %v1614_v6, %v3156_v11  ;;  %v1625_v60 = vmul.f32 %v3156_v11, %v3156_v11  ;;  %v1607_v15 = vpop.f32.mrb[15].mxu1 }
 0x4ab   :  { %v1616_v16 = vrot.slane %v1615_v59, 4  ;;  %v1628_v17 = vadd.f32 %v1627_v57, %v1625_v60 }
 0x4ad   :  { %v1617_v35 = vadd.f32 %v1616_v16, %v1615_v59  ;;  %v1629_v24 = vrot.slane %v1628_v17, 4 }
 0x4af   :  { %v1618_v18 = vrot.slane %v1617_v35, 2  ;;  %v1630_v25 = vadd.f32 %v1629_v24, %v1628_v17 }
 0x4b1   :  { %v1619_v8 = vadd.f32 %v1618_v18, %v1617_v35 }
 0x4b3   :  { %v1620_v22 = vrot.slane %v1619_v8, 1 }
 0x4b5   :  { %v1621_v34 = vadd.f32 %v1620_v22, %v1619_v8 }
 0x4b7   :  { %2281 = vmatmul.mubr.f32.vlgmr.msra.gmra.mrb[8].mxu0 %v1621_v34 }
 0x4b8   :  { %2402 = vmatpush3.bf16.msra.mxu0 %v2831_v47  ;;  %2315 = vmatprep.mubr.msk.f32.mxu0 %vm2613_vm10, %v2614_v56  ;;  %v1631_v47 = vrot.slane %v1630_v25, 2 }
 0x4b9   :  { %2403 = vmatprep.subr.bf16.mxu0 %v2612_v1 }
 0x4bc   :  { %2405 = vmatpush3.bf16.msra.mxu0 %v2835_v49  ;;  %v1632_v49 = vadd.f32 %v1631_v47, %v1630_v25 }
 0x4bd   :  { %2406 = vmatprep.subr.bf16.mxu0 %v2612_v1 }
 0x4c0   :  { %2408 = vmatpush3.bf16.msra.mxu0 %v2900_v38  ;;  %v1633_v38 = vrot.slane %v1632_v49, 1 }
 0x4c1   :  { %2409 = vmatprep.subr.bf16.mxu0 %v2612_v1 }
 0x4c4   :  { %2411 = vmatpush3.bf16.msra.mxu0 %v2912_v41  ;;  %v1634_v41 = vadd.f32 %v1633_v38, %v1632_v49 }
 0x4c5   :  { %2412 = vmatprep.subr.bf16.mxu0 %v2612_v1 }
 0x4c8   :  { %2414 = vmatpush3.bf16.msra.mxu0 %v2924_v44 }
 0x4c9   :  { %2415 = vmatprep.subr.bf16.mxu0 %v2612_v1 }
 0x4cc   :  { %2417 = vmatpush3.bf16.msra.mxu0 %v2936_v48 }
 0x4cd   :  { %2418 = vmatprep.subr.bf16.mxu0 %v2612_v1 }
 0x4d0   :  { %2420 = vmatpush3.bf16.msra.mxu0 %v2948_v52 }
 0x4d1   :  { %2421 = vmatprep.subr.bf16.mxu0 %v2612_v1 }
 0x4d4   :  { %2423 = vmatpush3.bf16.msra.mxu0 %v2960_v55 }
 0x4d5   :  { %2318 = vmatprep.subr.mxu0 %v2614_v56 }
 0x4d7   :  { %2316 = vmatmul.mubr.f32.vlgmr.msra.gmra.mrb[10].mxu0 %v1634_v41 }
 0x4d8   :  { %2319 = vmatpush3.msra.mxu0 %v3013_v28  ;;  %2320 = vmatprep.mubr.msk.f32.mxu0 %vm2613_vm10, %v2614_v56 }
 0x4d9   :  { %2323 = vmatprep.subr.mxu0 %v2614_v56 }
 0x58a   :  { %v1701_v44 = vpop.f32.mrb[8].mxu0 }
 0x58b   :  { %v2282_v48 = vpop.f32.mrb[9].mxu0  ;;  %v1705_v26 = vmul.f32 0.001953125, %v1701_v44 }
 0x58d   :  { %v1777_v27 = vmul.f32 %v1705_v26, %v1705_v26 }
 0x5aa   :  { %v1772_v52 = vpop.f32.mrb[10].mxu0 }
 0x5ab   :  { %v1776_v1 = vmul.f32 0.001953125, %v1772_v52  ;;  %v2317_v29 = vpop.f32.mrb[11].mxu0 }
 0x5ad   :  { %v1778_v30 = vsub.f32 %v1776_v1, %v1777_v27 }
 0x5af   :  { %v1780_v55 = vadd.f32 1e-05, %v1778_v30 }
 0x5b1   :  { %2529 = vrsqrt.f32 %v1780_v55 }
 0x5bb   :  { %v2530_v58 = vpop.eup %2529 }
 0x5bc   :  { %v1782_v33 = vmul.f32 %v2530_v58, %v1779_v31 }
 0x5be   :  { %2321 = vmatmul.mubr.msk.f32.vlgmr.msra.gmra.mrb[12].mxu0 %vm873_vm11, %v1782_v33  ;;  %v1784_v32 = vmul.f32 %v1782_v33, %v1705_v26 }
 0x5bf   :  { %2324 = vmatpush3.msra.mxu0 %v3013_v28  ;;  %2325 = vmatprep.mubr.msk.f32.mxu0 %vm2613_vm10, %v2614_v56 }
 0x5c0   :  { %v1785_v7 = vsub.f32 %v1783_v62, %v1784_v32 }
 0x5c2   :  { %2326 = vmatmul.mubr.msk.f32.vlgmr.msra.gmra.mrb[14].mxu0 %vm873_vm11, %v1785_v7 }
 0x691   :  { %v1855_v36 = vpop.f32.mrb[12].mxu0 }
 0x692   :  { %v1935_v12 = vrot.slane %v1855_v36, %v3038_v13  ;;  %v2322_v37 = vpop.f32.mrb[13].mxu0 }
 0x694   :  { %v1936_v39 = vmul.f32 %v1935_v12, %v3141_v51  ;;  %v1937_v19 = vmul.f32 %v1935_v12, %v3143_v54  ;;  %v1938_v20 = vmul.f32 %v1935_v12, %v3151_v5  ;;  %v1939_v40 = vmul.f32 %v1935_v12, %v3156_v11 }
 0x695   :  { %v1928_v42 = vpop.f32.mrb[14].mxu0 }
 0x696   :  { %v1943_v28 = vrot.slane %v1928_v42, %v3038_v13  ;;  %v2327_v43 = vpop.f32.mrb[15].mxu0  ;;  %v2533_v13 = vld [vmem:[%s3224_s0 + $0x10] sm:$0xff] }
 0x698   :  { %v1944_v56 = vadd.f32 %v1943_v28, %v1936_v39  ;;  %v1945_v45 = vadd.f32 %v1943_v28, %v1937_v19  ;;  %v1946_v21 = vadd.f32 %v1943_v28, %v1938_v20  ;;  %v1947_v46 = vadd.f32 %v1943_v28, %v1939_v40 }
 0x69a   :  { %v1948_v14 = vadd.f32 %v2531_v23, %v1944_v56  ;;  %v1949_v50 = vadd.f32 %v2532_v2, %v1945_v45  ;;  %v1950_v51 = vadd.f32 %v2533_v13, %v1946_v21  ;;  %v1951_v54 = vadd.f32 %v2534_v53, %v1947_v46 }
 0x69c   :  { %v1952_v0 = vmax.f32 %v1948_v14, 0.0  ;;  %v1953_v61 = vmax.f32 %v1949_v50, 0.0  ;;  %v1954_v63 = vmax.f32 %v1950_v51, 0.0  ;;  %v1955_v3 = vmax.f32 %v1951_v54, 0.0 }
 0x69e   :  { %1956 = vst [vmem:[#allocation8] sm:$0xff] %v1952_v0  ;;  %1957 = vst [vmem:[#allocation8 + $0x8] sm:$0xff] %v1953_v61 }
 0x69f   :  { %1958 = vst [vmem:[#allocation8 + $0x10] sm:$0xff] %v1954_v63  ;;  %1959 = vst [vmem:[#allocation8 + $0x18] sm:$0xff] %v1955_v3 }
 0x6a0   :  { %2590 = shalt.err (!%p2587_p6)
}
 0x6a1   :  { %s2591_s0 = scalar_lea.hbm %s3233_s9, 512 }
 0x6a2   :  { %p2592_p7 = scmp.ne.s32.totalorder %s3233_s9, %s2591_s0  ;;  %p2595_p8 = scmp.lt.u32.totalorder %s2591_s0, %s3233_s9 }
 0x6a4   :  { %p2597_p9 = pnand %p2595_p8, %p2592_p7 }
 0x6a6   :  { %2600 = shalt.err (!%p2597_p9)
}
 0x6a7   :  { %s2616_s27 = smov 128   ;;  %s2617_s28 = smov 8  }
 0x6a8   :  { %1971 = dma.vmem_to_hbm [thread:$0]  %s1966_s8, 512, %s3233_s9, [#allocation5], %s2616_s27, %s2616_s27, %s2617_s28  }
 0x6a9   :  { %2605 = dma.done.wait [#allocation5], 512  }
 0x6aa   :  { %2606 = vsyncadd [#allocation5], 4294966784 }
 0x6ab   :  { %1975 = vsyncpa [#allocation4], 1 }
 0x6ac   :  { %1976 = vsyncpa [#allocation7], 1 }
 0x6ad   :  { %1977 = vsyncpa [#allocation5], 1 }

</bundles_post_ra>
